<compile_context>
chip_gen: v5e
topology: v5e:2x2
jax: 0.10.0
libtpu: 0.0.40
codegen_flags: <defaults>
</compile_context>

<pallas_src>
import numpy as np
import jax
import jax.numpy as jnp
from jax.experimental import pallas as pl
from jax.experimental.pallas import tpu as pltpu

K_ROUND = 3  # kept for API compatibility with DiffJPEG(k, ...)

# Deterministic "quantization_table" parameter: standard JPEG luminance table.
QUANT_TABLE = np.array(
    [[16, 11, 10, 16, 24, 40, 51, 61],
     [12, 12, 14, 19, 26, 58, 60, 55],
     [14, 13, 16, 24, 40, 57, 69, 56],
     [14, 17, 22, 29, 51, 87, 80, 62],
     [18, 22, 37, 56, 68, 109, 103, 77],
     [24, 35, 55, 64, 81, 104, 113, 92],
     [49, 64, 78, 87, 103, 121, 120, 101],
     [72, 92, 95, 98, 112, 100, 103, 99]], dtype=np.float32)


# --------------------- host-side constant folding ---------------------

def _blockdiag(block, n):
    br, bc = block.shape
    m = np.zeros((br * n, bc * n), np.float64)
    for i in range(n):
        m[i * br:(i + 1) * br, i * bc:(i + 1) * bc] = block
    return m


def _build_constants(tr, cw, quant_table):
    """Block-diagonal separable DCT/IDCT matrices for a (tr, cw) image chunk.

    Luma: per-8-row / per-8-col DCT and IDCT.
    Chroma: the 2x2 subsample (fwd) and nearest 2x upsample (inv) are folded
    into rectangular 8x16 / 16x8 diagonal blocks, so chroma maps
    (tr, cw) <-> (tr/2, cw/2) purely via matmuls.
    Quantization (0.25*a_u*a_v/q and 0.25*a_u*a_v*q) is an elementwise tiled
    scale applied between the two matmul stages (q is not separable).
    """
    xs = np.arange(8)
    cm = np.cos((2 * xs[:, None] + 1) * xs[None, :] * np.pi / 16)  # cm[x, u]
    alpha = np.array([1.0 / np.sqrt(2)] + [1.0] * 7)
    aa = np.outer(alpha, alpha)
    q = np.asarray(quant_table, np.float64)

    # luma (full resolution)
    lfy = _blockdiag(cm.T, tr // 8)       # (tr, tr)    rows: u, cols: x
    rfy = _blockdiag(cm, cw // 8)         # (cw, cw)    rows: y, cols: v
    liy = _blockdiag(cm, tr // 8)         # (tr, tr)    rows: x, cols: u
    riy = _blockdiag(cm.T, cw // 8)       # (cw, cw)    rows: v, cols: y

    # chroma: fuse 2x2 mean subsample into the forward DCT and nearest 2x
    # upsample into the inverse DCT.
    half = cm[np.arange(16) // 2, :]      # (16, 8): half[x_full, u] = cm[x//2, u]
    lfc = _blockdiag(0.5 * half.T, tr // 16)   # (tr/2, tr)
    rfc = _blockdiag(0.5 * half, cw // 16)     # (cw, cw/2)
    lic = _blockdiag(half, tr // 16)           # (tr, tr/2)
    ric = _blockdiag(half.T, cw // 16)         # (cw/2, cw)

    # elementwise quantize / dequantize scale tiles (period-8 pattern)
    sf8 = 0.25 * aa / q
    si8 = 0.25 * aa * q
    sfy = np.tile(sf8, (tr // 8, cw // 8))       # (tr, cw)
    siy = np.tile(si8, (tr // 8, cw // 8))       # (tr, cw)
    sfc = np.tile(sf8, (tr // 16, cw // 16))     # (tr/2, cw/2)
    sic = np.tile(si8, (tr // 16, cw // 16))     # (tr/2, cw/2)

    consts = [lfy, rfy, liy, riy, lfc, rfc, lic, ric, sfy, siy, sfc, sic]
    return [c.astype(np.float32) for c in consts]


# ---------------------------- tile selection ----------------------------

def _mult16_divisors(v):
    return [d for d in range(16, v + 1, 16) if v % d == 0]


def _pick_col_chunk(w):
    """Column chunk for the right-hand (per-8-col) matmuls."""
    if w % 128 == 0 and w >= 128:
        # lane-aligned chunks; cap unroll count for very wide images
        return 256 if (w % 256 == 0 and w > 2048) else 128
    if w <= 256:
        return w
    divs = _mult16_divisors(w)
    le = [d for d in divs if d <= 256]
    best = max(le)
    if best < 128:
        ge = [d for d in divs if d >= 128]
        if ge:
            best = min(ge)
    return best


def _pick_row_tile(n, h, w):
    """Row-strip height: multiple of 16, divides h, bounded by a VMEM budget."""
    divs = _mult16_divisors(h)
    budget_rows = max(16, (512 * 1024) // (4 * w))   # <= 512 KiB per f32 plane strip
    cap = min(128, budget_rows)
    cands = [d for d in divs if d <= cap]
    tr = max(cands) if cands else 16
    # keep >= 2 grid steps when possible (v7x has 2 TensorCores per chip)
    if n * (h // tr) < 2:
        smaller = [d for d in divs if d <= h // 2]
        if smaller:
            tr = max(smaller)
    return tr


# ----------------------------- Pallas kernel -----------------------------

def _make_jpeg_kernel(differentiable):
    def kernel(x_ref, lfy_ref, rfy_ref, liy_ref, riy_ref,
               lfc_ref, rfc_ref, lic_ref, ric_ref,
               sfy_ref, siy_ref, sfc_ref, sic_ref, o_ref):
        inv255 = 1.0 / 255.0
        r = x_ref[0, 0] * 255.0
        g = x_ref[0, 1] * 255.0
        b = x_ref[0, 2] * 255.0
        # RGB -> YCbCr.  Luma: -128 level shift folded in here; chroma: the
        # +128 offset and the DCT -128 level shift cancel, so stay centered.
        y = 0.299 * r + 0.587 * g + 0.114 * b - 128.0
        cb = -0.168736 * r - 0.331264 * g + 0.5 * b
        cr = 0.5 * r - 0.418688 * g - 0.081312 * b

        lfy = lfy_ref[...]
        rfy = rfy_ref[...]
        liy = liy_ref[...]
        riy = riy_ref[...]
        lfc = lfc_ref[...]
        rfc = rfc_ref[...]
        lic = lic_ref[...]
        ric = ric_ref[...]
        sfy = sfy_ref[...]
        siy = siy_ref[...]
        sfc = sfc_ref[...]
        sic = sic_ref[...]

        w = y.shape[1]
        cw = rfy.shape[0]

        def dot32(a, m):
            return jnp.dot(a, m, preferred_element_type=jnp.float32)

        def rnd(v):
            rv = jnp.round(v)
            return rv + (v - rv) ** 3 if differentiable else rv

        # Row (vertical) transforms over the full strip width:
        #   luma   : per-8-row DCT
        #   chroma : fused 2x row-subsample + per-8-row DCT  -> (tr/2, w)
        ty = dot32(lfy, y)
        tcb = dot32(lfc, cb)
        tcr = dot32(lfc, cr)

        for j in range(w // cw):
            cs = slice(j * cw, (j + 1) * cw)
            # forward column transform (+ fused chroma column subsample),
            # then quantize (elementwise scale).
            qy = dot32(ty[:, cs], rfy) * sfy
            qcb = dot32(tcb[:, cs], rfc) * sfc
            qcr = dot32(tcr[:, cs], rfc) * sfc
            # differentiable rounding + dequantize.
            my = rnd(qy) * siy
            mcb = rnd(qcb) * sic
            mcr = rnd(qcr) * sic
            # inverse transforms; chroma folds nearest-neighbour 2x upsample.
            y2 = dot32(dot32(liy, my), riy) + 128.0
            cb2 = dot32(dot32(lic, mcb), ric)
            cr2 = dot32(dot32(lic, mcr), ric)
            # YCbCr -> RGB, clamp to [0, 255], back to [0, 1].
            o_ref[0, 0, :, cs] = jnp.clip(y2 + 1.402 * cr2, 0.0, 255.0) * inv255
            o_ref[0, 1, :, cs] = jnp.clip(
                y2 - 0.344136 * cb2 - 0.714136 * cr2, 0.0, 255.0) * inv255
            o_ref[0, 2, :, cs] = jnp.clip(y2 + 1.772 * cb2, 0.0, 255.0) * inv255

    return kernel


# ------------------------------ public API ------------------------------

def diff_jpeg_forward(x, quant_table=QUANT_TABLE, k=K_ROUND, differentiable=True):
    x = x.astype(jnp.float32)
    n, c, h, w = x.shape
    assert c == 3 and h % 16 == 0 and w % 16 == 0

    tr = _pick_row_tile(n, h, w)
    cw = _pick_col_chunk(w)
    assert h % tr == 0 and w % cw == 0 and tr % 16 == 0 and cw % 16 == 0

    consts_np = _build_constants(tr, cw, quant_table)
    consts = [jnp.asarray(m) for m in consts_np]

    img_spec = pl.BlockSpec((1, 3, tr, w), lambda i, j: (i, 0, j, 0))
    const_specs = [pl.BlockSpec(m.shape, lambda i, j: (0, 0)) for m in consts_np]

    out = pl.pallas_call(
        _make_jpeg_kernel(differentiable),
        out_shape=jax.ShapeDtypeStruct((n, 3, h, w), jnp.float32),
        grid=(n, h // tr),
        in_specs=[img_spec] + const_specs,
        out_specs=img_spec,
        compiler_params=pltpu.CompilerParams(
            dimension_semantics=("parallel", "parallel"),
            vmem_limit_bytes=32 * 1024 * 1024),
    )(x, *consts)
    return out


# -------------------- pure-JAX reference (for self-test) --------------------

def _reference_forward(x, quant_table=QUANT_TABLE, differentiable=True):
    x = x.astype(jnp.float32)
    n, _, h, w = x.shape
    hp = jax.lax.Precision.HIGHEST
    r, g, b = x[:, 0] * 255.0, x[:, 1] * 255.0, x[:, 2] * 255.0
    y = 0.299 * r + 0.587 * g + 0.114 * b
    cb = -0.168736 * r - 0.331264 * g + 0.5 * b + 128.0
    cr = 0.5 * r - 0.418688 * g - 0.081312 * b + 128.0

    def subsample(p):
        return p.reshape(n, h // 2, 2, w // 2, 2).mean(axis=(2, 4))

    xs = np.arange(8)
    cm = jnp.asarray(np.cos((2 * xs[:, None] + 1) * xs[None, :] * np.pi / 16),
                     jnp.float32)
    alpha = np.array([1.0 / np.sqrt(2)] + [1.0] * 7)
    aa = jnp.asarray(np.outer(alpha, alpha), jnp.float32)
    q = jnp.asarray(quant_table, jnp.float32)

    def jpeg_plane(p, hh, ww):
        blk = p.reshape(n, hh // 8, 8, ww // 8, 8).transpose(0, 1, 3, 2, 4) - 128.0
        d = 0.25 * aa * jnp.einsum('nijxy,xu,yv->nijuv', blk, cm, cm, precision=hp)
        qd = d / q
        rq = jnp.round(qd)
        if differentiable:
            rq = rq + (qd - rq) ** 3
        m = 0.25 * aa * (rq * q)
        out = jnp.einsum('nijuv,xu,yv->nijxy', m, cm, cm, precision=hp) + 128.0
        return out.transpose(0, 1, 3, 2, 4).reshape(n, hh, ww)

    y2 = jpeg_plane(y, h, w)
    cb2 = jnp.repeat(jnp.repeat(jpeg_plane(subsample(cb), h // 2, w // 2), 2, 1), 2, 2)
    cr2 = jnp.repeat(jnp.repeat(jpeg_plane(subsample(cr), h // 2, w // 2), 2, 1), 2, 2)
    r2 = jnp.clip(y2 + 1.402 * (cr2 - 128.0), 0.0, 255.0) / 255.0
    g2 = jnp.clip(y2 - 0.344136 * (cb2 - 128.0) - 0.714136 * (cr2 - 128.0),
                  0.0, 255.0) / 255.0
    b2 = jnp.clip(y2 + 1.772 * (cb2 - 128.0), 0.0, 255.0) / 255.0
    return jnp.stack([r2, g2, b2], axis=1)


if __name__ == "__main__":
    key = jax.random.PRNGKey(0)
    x = jax.random.uniform(key, (2, 3, 64, 64), dtype=jnp.float32)  # NCHW, [0, 1]
    out = jax.jit(diff_jpeg_forward)(x)
    jax.block_until_ready(out)
    assert out.shape == x.shape and out.dtype == jnp.float32
    assert bool(jnp.all(jnp.isfinite(out)))
    assert bool(jnp.all((out >= 0.0) & (out <= 1.0)))

    ref = _reference_forward(x)
    diff = jnp.abs(out - ref)
    # Robust aggregate tolerances (a rare rounding-boundary flip only perturbs
    # one 8x8 block, so mean stays tiny; a structural bug would blow this up).
    assert float(jnp.mean(diff)) < 2e-3, float(jnp.mean(diff))
    assert float(jnp.max(diff)) < 0.5, float(jnp.max(diff))
    print("KERNEL_OK")
</pallas_src>

<mosaic_0001>
module attributes {stable_mosaic.version = 11 : i64} {
  func.func @kernel(%arg0: i32, %arg1: i32, %arg2: memref<1x3x64x64xf32, #tpu.memory_space<vmem>>, %arg3: memref<64x64xf32, #tpu.memory_space<vmem>>, %arg4: memref<64x64xf32, #tpu.memory_space<vmem>>, %arg5: memref<64x64xf32, #tpu.memory_space<vmem>>, %arg6: memref<64x64xf32, #tpu.memory_space<vmem>>, %arg7: memref<32x64xf32, #tpu.memory_space<vmem>>, %arg8: memref<64x32xf32, #tpu.memory_space<vmem>>, %arg9: memref<64x32xf32, #tpu.memory_space<vmem>>, %arg10: memref<32x64xf32, #tpu.memory_space<vmem>>, %arg11: memref<64x64xf32, #tpu.memory_space<vmem>>, %arg12: memref<64x64xf32, #tpu.memory_space<vmem>>, %arg13: memref<32x32xf32, #tpu.memory_space<vmem>>, %arg14: memref<32x32xf32, #tpu.memory_space<vmem>>, %arg15: memref<1x3x64x64xf32, #tpu.memory_space<vmem>>) attributes {dimension_semantics = [#tpu.dimension_semantics<parallel>, #tpu.dimension_semantics<parallel>], iteration_bounds = array<i64: 2, 1>, scalar_prefetch = 0 : i64, scratch_operands = 0 : i64, tpu.core_type = #tpu.core_type<tc>, window_params = [{transform_indices = @transform_0, window_bounds = array<i64: 1, 3, 64, 64>}, {pipeline_mode = #tpu.pipeline_mode<synchronous>, transform_indices = @transform_1, window_bounds = array<i64: 64, 64>}, {pipeline_mode = #tpu.pipeline_mode<synchronous>, transform_indices = @transform_2, window_bounds = array<i64: 64, 64>}, {pipeline_mode = #tpu.pipeline_mode<synchronous>, transform_indices = @transform_3, window_bounds = array<i64: 64, 64>}, {pipeline_mode = #tpu.pipeline_mode<synchronous>, transform_indices = @transform_4, window_bounds = array<i64: 64, 64>}, {pipeline_mode = #tpu.pipeline_mode<synchronous>, transform_indices = @transform_5, window_bounds = array<i64: 32, 64>}, {pipeline_mode = #tpu.pipeline_mode<synchronous>, transform_indices = @transform_6, window_bounds = array<i64: 64, 32>}, {pipeline_mode = #tpu.pipeline_mode<synchronous>, transform_indices = @transform_7, window_bounds = array<i64: 64, 32>}, {pipeline_mode = #tpu.pipeline_mode<synchronous>, transform_indices = @transform_8, window_bounds = array<i64: 32, 64>}, {pipeline_mode = #tpu.pipeline_mode<synchronous>, transform_indices = @transform_9, window_bounds = array<i64: 64, 64>}, {pipeline_mode = #tpu.pipeline_mode<synchronous>, transform_indices = @transform_10, window_bounds = array<i64: 64, 64>}, {pipeline_mode = #tpu.pipeline_mode<synchronous>, transform_indices = @transform_11, window_bounds = array<i64: 32, 32>}, {pipeline_mode = #tpu.pipeline_mode<synchronous>, transform_indices = @transform_12, window_bounds = array<i64: 32, 32>}, {transform_indices = @transform_13, window_bounds = array<i64: 1, 3, 64, 64>}]} {
    %c0 = arith.constant 0 : index
    %c0_0 = arith.constant 0 : index
    %c0_1 = arith.constant 0 : index
    %c0_2 = arith.constant 0 : index
    %0 = vector.load %arg2[%c0, %c0_0, %c0_1, %c0_2] : memref<1x3x64x64xf32, #tpu.memory_space<vmem>>, vector<1x1x64x64xf32>
    %1 = vector.shape_cast %0 : vector<1x1x64x64xf32> to vector<64x64xf32>
    %cst = arith.constant 2.550000e+02 : f32
    %2 = vector.broadcast %cst : f32 to vector<64x64xf32>
    %3 = arith.mulf %1, %2 : vector<64x64xf32>
    %c0_3 = arith.constant 0 : index
    %c1 = arith.constant 1 : index
    %c0_4 = arith.constant 0 : index
    %c0_5 = arith.constant 0 : index
    %4 = vector.load %arg2[%c0_3, %c1, %c0_4, %c0_5] : memref<1x3x64x64xf32, #tpu.memory_space<vmem>>, vector<1x1x64x64xf32>
    %5 = vector.shape_cast %4 : vector<1x1x64x64xf32> to vector<64x64xf32>
    %cst_6 = arith.constant 2.550000e+02 : f32
    %6 = vector.broadcast %cst_6 : f32 to vector<64x64xf32>
    %7 = arith.mulf %5, %6 : vector<64x64xf32>
    %c0_7 = arith.constant 0 : index
    %c2 = arith.constant 2 : index
    %c0_8 = arith.constant 0 : index
    %c0_9 = arith.constant 0 : index
    %8 = vector.load %arg2[%c0_7, %c2, %c0_8, %c0_9] : memref<1x3x64x64xf32, #tpu.memory_space<vmem>>, vector<1x1x64x64xf32>
    %9 = vector.shape_cast %8 : vector<1x1x64x64xf32> to vector<64x64xf32>
    %cst_10 = arith.constant 2.550000e+02 : f32
    %10 = vector.broadcast %cst_10 : f32 to vector<64x64xf32>
    %11 = arith.mulf %9, %10 : vector<64x64xf32>
    %cst_11 = arith.constant 2.990000e-01 : f32
    %12 = vector.broadcast %cst_11 : f32 to vector<64x64xf32>
    %13 = arith.mulf %12, %3 : vector<64x64xf32>
    %cst_12 = arith.constant 5.870000e-01 : f32
    %14 = vector.broadcast %cst_12 : f32 to vector<64x64xf32>
    %15 = arith.mulf %14, %7 : vector<64x64xf32>
    %16 = arith.addf %13, %15 : vector<64x64xf32>
    %cst_13 = arith.constant 1.140000e-01 : f32
    %17 = vector.broadcast %cst_13 : f32 to vector<64x64xf32>
    %18 = arith.mulf %17, %11 : vector<64x64xf32>
    %19 = arith.addf %16, %18 : vector<64x64xf32>
    %cst_14 = arith.constant 1.280000e+02 : f32
    %20 = vector.broadcast %cst_14 : f32 to vector<64x64xf32>
    %21 = arith.subf %19, %20 : vector<64x64xf32>
    %cst_15 = arith.constant -1.687360e-01 : f32
    %22 = vector.broadcast %cst_15 : f32 to vector<64x64xf32>
    %23 = arith.mulf %22, %3 : vector<64x64xf32>
    %cst_16 = arith.constant 3.312640e-01 : f32
    %24 = vector.broadcast %cst_16 : f32 to vector<64x64xf32>
    %25 = arith.mulf %24, %7 : vector<64x64xf32>
    %26 = arith.subf %23, %25 : vector<64x64xf32>
    %cst_17 = arith.constant 5.000000e-01 : f32
    %27 = vector.broadcast %cst_17 : f32 to vector<64x64xf32>
    %28 = arith.mulf %27, %11 : vector<64x64xf32>
    %29 = arith.addf %26, %28 : vector<64x64xf32>
    %cst_18 = arith.constant 5.000000e-01 : f32
    %30 = vector.broadcast %cst_18 : f32 to vector<64x64xf32>
    %31 = arith.mulf %30, %3 : vector<64x64xf32>
    %cst_19 = arith.constant 4.186880e-01 : f32
    %32 = vector.broadcast %cst_19 : f32 to vector<64x64xf32>
    %33 = arith.mulf %32, %7 : vector<64x64xf32>
    %34 = arith.subf %31, %33 : vector<64x64xf32>
    %cst_20 = arith.constant 8.131200e-02 : f32
    %35 = vector.broadcast %cst_20 : f32 to vector<64x64xf32>
    %36 = arith.mulf %35, %11 : vector<64x64xf32>
    %37 = arith.subf %34, %36 : vector<64x64xf32>
    %c0_21 = arith.constant 0 : index
    %c0_22 = arith.constant 0 : index
    %38 = vector.load %arg3[%c0_21, %c0_22] : memref<64x64xf32, #tpu.memory_space<vmem>>, vector<64x64xf32>
    %c0_23 = arith.constant 0 : index
    %c0_24 = arith.constant 0 : index
    %39 = vector.load %arg4[%c0_23, %c0_24] : memref<64x64xf32, #tpu.memory_space<vmem>>, vector<64x64xf32>
    %c0_25 = arith.constant 0 : index
    %c0_26 = arith.constant 0 : index
    %40 = vector.load %arg5[%c0_25, %c0_26] : memref<64x64xf32, #tpu.memory_space<vmem>>, vector<64x64xf32>
    %c0_27 = arith.constant 0 : index
    %c0_28 = arith.constant 0 : index
    %41 = vector.load %arg6[%c0_27, %c0_28] : memref<64x64xf32, #tpu.memory_space<vmem>>, vector<64x64xf32>
    %c0_29 = arith.constant 0 : index
    %c0_30 = arith.constant 0 : index
    %42 = vector.load %arg7[%c0_29, %c0_30] : memref<32x64xf32, #tpu.memory_space<vmem>>, vector<32x64xf32>
    %c0_31 = arith.constant 0 : index
    %c0_32 = arith.constant 0 : index
    %43 = vector.load %arg8[%c0_31, %c0_32] : memref<64x32xf32, #tpu.memory_space<vmem>>, vector<64x32xf32>
    %c0_33 = arith.constant 0 : index
    %c0_34 = arith.constant 0 : index
    %44 = vector.load %arg9[%c0_33, %c0_34] : memref<64x32xf32, #tpu.memory_space<vmem>>, vector<64x32xf32>
    %c0_35 = arith.constant 0 : index
    %c0_36 = arith.constant 0 : index
    %45 = vector.load %arg10[%c0_35, %c0_36] : memref<32x64xf32, #tpu.memory_space<vmem>>, vector<32x64xf32>
    %c0_37 = arith.constant 0 : index
    %c0_38 = arith.constant 0 : index
    %46 = vector.load %arg11[%c0_37, %c0_38] : memref<64x64xf32, #tpu.memory_space<vmem>>, vector<64x64xf32>
    %c0_39 = arith.constant 0 : index
    %c0_40 = arith.constant 0 : index
    %47 = vector.load %arg12[%c0_39, %c0_40] : memref<64x64xf32, #tpu.memory_space<vmem>>, vector<64x64xf32>
    %c0_41 = arith.constant 0 : index
    %c0_42 = arith.constant 0 : index
    %48 = vector.load %arg13[%c0_41, %c0_42] : memref<32x32xf32, #tpu.memory_space<vmem>>, vector<32x32xf32>
    %c0_43 = arith.constant 0 : index
    %c0_44 = arith.constant 0 : index
    %49 = vector.load %arg14[%c0_43, %c0_44] : memref<32x32xf32, #tpu.memory_space<vmem>>, vector<32x32xf32>
    %cst_45 = arith.constant dense<0.000000e+00> : vector<64x64xf32>
    %50 = tpu.matmul %38, %21, %cst_45 {dimension_numbers = #tpu.dot_dimension_numbers<[1], [0], [0], [1], [0, 0, 1, 1], [], []>} : vector<64x64xf32>, vector<64x64xf32>, vector<64x64xf32> -> vector<64x64xf32>
    %cst_46 = arith.constant dense<0.000000e+00> : vector<32x64xf32>
    %51 = tpu.matmul %42, %29, %cst_46 {dimension_numbers = #tpu.dot_dimension_numbers<[1], [0], [0], [1], [0, 0, 1, 1], [], []>} : vector<32x64xf32>, vector<64x64xf32>, vector<32x64xf32> -> vector<32x64xf32>
    %cst_47 = arith.constant dense<0.000000e+00> : vector<32x64xf32>
    %52 = tpu.matmul %42, %37, %cst_47 {dimension_numbers = #tpu.dot_dimension_numbers<[1], [0], [0], [1], [0, 0, 1, 1], [], []>} : vector<32x64xf32>, vector<64x64xf32>, vector<32x64xf32> -> vector<32x64xf32>
    %cst_48 = arith.constant dense<0.000000e+00> : vector<64x64xf32>
    %53 = tpu.matmul %50, %39, %cst_48 {dimension_numbers = #tpu.dot_dimension_numbers<[1], [0], [0], [1], [0, 0, 1, 1], [], []>} : vector<64x64xf32>, vector<64x64xf32>, vector<64x64xf32> -> vector<64x64xf32>
    %54 = arith.mulf %53, %46 : vector<64x64xf32>
    %cst_49 = arith.constant dense<0.000000e+00> : vector<32x32xf32>
    %55 = tpu.matmul %51, %43, %cst_49 {dimension_numbers = #tpu.dot_dimension_numbers<[1], [0], [0], [1], [0, 0, 1, 1], [], []>} : vector<32x64xf32>, vector<64x32xf32>, vector<32x32xf32> -> vector<32x32xf32>
    %56 = arith.mulf %55, %48 : vector<32x32xf32>
    %cst_50 = arith.constant dense<0.000000e+00> : vector<32x32xf32>
    %57 = tpu.matmul %52, %43, %cst_50 {dimension_numbers = #tpu.dot_dimension_numbers<[1], [0], [0], [1], [0, 0, 1, 1], [], []>} : vector<32x64xf32>, vector<64x32xf32>, vector<32x32xf32> -> vector<32x32xf32>
    %58 = arith.mulf %57, %48 : vector<32x32xf32>
    %59 = math.roundeven %54 : vector<64x64xf32>
    %60 = arith.subf %54, %59 : vector<64x64xf32>
    %61 = arith.mulf %60, %60 : vector<64x64xf32>
    %62 = arith.mulf %60, %61 : vector<64x64xf32>
    %63 = arith.addf %59, %62 : vector<64x64xf32>
    %64 = arith.mulf %63, %47 : vector<64x64xf32>
    %65 = math.roundeven %56 : vector<32x32xf32>
    %66 = arith.subf %56, %65 : vector<32x32xf32>
    %67 = arith.mulf %66, %66 : vector<32x32xf32>
    %68 = arith.mulf %66, %67 : vector<32x32xf32>
    %69 = arith.addf %65, %68 : vector<32x32xf32>
    %70 = arith.mulf %69, %49 : vector<32x32xf32>
    %71 = math.roundeven %58 : vector<32x32xf32>
    %72 = arith.subf %58, %71 : vector<32x32xf32>
    %73 = arith.mulf %72, %72 : vector<32x32xf32>
    %74 = arith.mulf %72, %73 : vector<32x32xf32>
    %75 = arith.addf %71, %74 : vector<32x32xf32>
    %76 = arith.mulf %75, %49 : vector<32x32xf32>
    %cst_51 = arith.constant dense<0.000000e+00> : vector<64x64xf32>
    %77 = tpu.matmul %40, %64, %cst_51 {dimension_numbers = #tpu.dot_dimension_numbers<[1], [0], [0], [1], [0, 0, 1, 1], [], []>} : vector<64x64xf32>, vector<64x64xf32>, vector<64x64xf32> -> vector<64x64xf32>
    %cst_52 = arith.constant dense<0.000000e+00> : vector<64x64xf32>
    %78 = tpu.matmul %77, %41, %cst_52 {dimension_numbers = #tpu.dot_dimension_numbers<[1], [0], [0], [1], [0, 0, 1, 1], [], []>} : vector<64x64xf32>, vector<64x64xf32>, vector<64x64xf32> -> vector<64x64xf32>
    %cst_53 = arith.constant 1.280000e+02 : f32
    %79 = vector.broadcast %cst_53 : f32 to vector<64x64xf32>
    %80 = arith.addf %78, %79 : vector<64x64xf32>
    %cst_54 = arith.constant dense<0.000000e+00> : vector<64x32xf32>
    %81 = tpu.matmul %44, %70, %cst_54 {dimension_numbers = #tpu.dot_dimension_numbers<[1], [0], [0], [1], [0, 0, 1, 1], [], []>} : vector<64x32xf32>, vector<32x32xf32>, vector<64x32xf32> -> vector<64x32xf32>
    %cst_55 = arith.constant dense<0.000000e+00> : vector<64x64xf32>
    %82 = tpu.matmul %81, %45, %cst_55 {dimension_numbers = #tpu.dot_dimension_numbers<[1], [0], [0], [1], [0, 0, 1, 1], [], []>} : vector<64x32xf32>, vector<32x64xf32>, vector<64x64xf32> -> vector<64x64xf32>
    %cst_56 = arith.constant dense<0.000000e+00> : vector<64x32xf32>
    %83 = tpu.matmul %44, %76, %cst_56 {dimension_numbers = #tpu.dot_dimension_numbers<[1], [0], [0], [1], [0, 0, 1, 1], [], []>} : vector<64x32xf32>, vector<32x32xf32>, vector<64x32xf32> -> vector<64x32xf32>
    %cst_57 = arith.constant dense<0.000000e+00> : vector<64x64xf32>
    %84 = tpu.matmul %83, %45, %cst_57 {dimension_numbers = #tpu.dot_dimension_numbers<[1], [0], [0], [1], [0, 0, 1, 1], [], []>} : vector<64x32xf32>, vector<32x64xf32>, vector<64x64xf32> -> vector<64x64xf32>
    %cst_58 = arith.constant 1.402000e+00 : f32
    %85 = vector.broadcast %cst_58 : f32 to vector<64x64xf32>
    %86 = arith.mulf %85, %84 : vector<64x64xf32>
    %87 = arith.addf %80, %86 : vector<64x64xf32>
    %cst_59 = arith.constant 0.000000e+00 : f32
    %cst_60 = arith.constant 2.550000e+02 : f32
    %88 = vector.broadcast %cst_59 : f32 to vector<64x64xf32>
    %89 = arith.maximumf %88, %87 : vector<64x64xf32>
    %90 = vector.broadcast %cst_60 : f32 to vector<64x64xf32>
    %91 = arith.minimumf %90, %89 : vector<64x64xf32>
    %cst_61 = arith.constant 0.00392156886 : f32
    %92 = vector.broadcast %cst_61 : f32 to vector<64x64xf32>
    %93 = arith.mulf %91, %92 : vector<64x64xf32>
    %c0_62 = arith.constant 0 : index
    %c0_63 = arith.constant 0 : index
    %c0_64 = arith.constant 0 : index
    %c0_65 = arith.constant 0 : index
    %94 = vector.load %arg15[%c0_62, %c0_63, %c0_64, %c0_65] : memref<1x3x64x64xf32, #tpu.memory_space<vmem>>, vector<1x1x64x64xf32>
    %95 = vector.shape_cast %94 : vector<1x1x64x64xf32> to vector<64x64xf32>
    %96 = vector.shape_cast %93 : vector<64x64xf32> to vector<1x1x64x64xf32>
    tpu.vector_store %arg15[%c0_62, %c0_63, %c0_64, %c0_65], %96 {strides = array<i32>} : memref<1x3x64x64xf32, #tpu.memory_space<vmem>>, vector<1x1x64x64xf32>,
    %cst_66 = arith.constant 3.441360e-01 : f32
    %97 = vector.broadcast %cst_66 : f32 to vector<64x64xf32>
    %98 = arith.mulf %97, %82 : vector<64x64xf32>
    %99 = arith.subf %80, %98 : vector<64x64xf32>
    %cst_67 = arith.constant 7.141360e-01 : f32
    %100 = vector.broadcast %cst_67 : f32 to vector<64x64xf32>
    %101 = arith.mulf %100, %84 : vector<64x64xf32>
    %102 = arith.subf %99, %101 : vector<64x64xf32>
    %cst_68 = arith.constant 0.000000e+00 : f32
    %cst_69 = arith.constant 2.550000e+02 : f32
    %103 = vector.broadcast %cst_68 : f32 to vector<64x64xf32>
    %104 = arith.maximumf %103, %102 : vector<64x64xf32>
    %105 = vector.broadcast %cst_69 : f32 to vector<64x64xf32>
    %106 = arith.minimumf %105, %104 : vector<64x64xf32>
    %cst_70 = arith.constant 0.00392156886 : f32
    %107 = vector.broadcast %cst_70 : f32 to vector<64x64xf32>
    %108 = arith.mulf %106, %107 : vector<64x64xf32>
    %c0_71 = arith.constant 0 : index
    %c1_72 = arith.constant 1 : index
    %c0_73 = arith.constant 0 : index
    %c0_74 = arith.constant 0 : index
    %109 = vector.load %arg15[%c0_71, %c1_72, %c0_73, %c0_74] : memref<1x3x64x64xf32, #tpu.memory_space<vmem>>, vector<1x1x64x64xf32>
    %110 = vector.shape_cast %109 : vector<1x1x64x64xf32> to vector<64x64xf32>
    %111 = vector.shape_cast %108 : vector<64x64xf32> to vector<1x1x64x64xf32>
    tpu.vector_store %arg15[%c0_71, %c1_72, %c0_73, %c0_74], %111 {strides = array<i32>} : memref<1x3x64x64xf32, #tpu.memory_space<vmem>>, vector<1x1x64x64xf32>,
    %cst_75 = arith.constant 1.772000e+00 : f32
    %112 = vector.broadcast %cst_75 : f32 to vector<64x64xf32>
    %113 = arith.mulf %112, %82 : vector<64x64xf32>
    %114 = arith.addf %80, %113 : vector<64x64xf32>
    %cst_76 = arith.constant 0.000000e+00 : f32
    %cst_77 = arith.constant 2.550000e+02 : f32
    %115 = vector.broadcast %cst_76 : f32 to vector<64x64xf32>
    %116 = arith.maximumf %115, %114 : vector<64x64xf32>
    %117 = vector.broadcast %cst_77 : f32 to vector<64x64xf32>
    %118 = arith.minimumf %117, %116 : vector<64x64xf32>
    %cst_78 = arith.constant 0.00392156886 : f32
    %119 = vector.broadcast %cst_78 : f32 to vector<64x64xf32>
    %120 = arith.mulf %118, %119 : vector<64x64xf32>
    %c0_79 = arith.constant 0 : index
    %c2_80 = arith.constant 2 : index
    %c0_81 = arith.constant 0 : index
    %c0_82 = arith.constant 0 : index
    %121 = vector.load %arg15[%c0_79, %c2_80, %c0_81, %c0_82] : memref<1x3x64x64xf32, #tpu.memory_space<vmem>>, vector<1x1x64x64xf32>
    %122 = vector.shape_cast %121 : vector<1x1x64x64xf32> to vector<64x64xf32>
    %123 = vector.shape_cast %120 : vector<64x64xf32> to vector<1x1x64x64xf32>
    tpu.vector_store %arg15[%c0_79, %c2_80, %c0_81, %c0_82], %123 {strides = array<i32>} : memref<1x3x64x64xf32, #tpu.memory_space<vmem>>, vector<1x1x64x64xf32>,
    return
  }
  func.func @transform_0(%arg0: i32, %arg1: i32) -> (i32, i32, i32, i32) {
    %c0_i32 = arith.constant 0 : i32
    %c0_i32_0 = arith.constant 0 : i32
    %c0_i32_1 = arith.constant 0 : i32
    return %arg0, %c0_i32, %arg1, %c0_i32_0 : i32, i32, i32, i32
  }
  func.func @transform_1(%arg0: i32, %arg1: i32) -> (i32, i32) {
    %c0_i32 = arith.constant 0 : i32
    %c0_i32_0 = arith.constant 0 : i32
    %c0_i32_1 = arith.constant 0 : i32
    return %c0_i32, %c0_i32_0 : i32, i32
  }
  func.func @transform_2(%arg0: i32, %arg1: i32) -> (i32, i32) {
    %c0_i32 = arith.constant 0 : i32
    %c0_i32_0 = arith.constant 0 : i32
    %c0_i32_1 = arith.constant 0 : i32
    return %c0_i32, %c0_i32_0 : i32, i32
  }
  func.func @transform_3(%arg0: i32, %arg1: i32) -> (i32, i32) {
    %c0_i32 = arith.constant 0 : i32
    %c0_i32_0 = arith.constant 0 : i32
    %c0_i32_1 = arith.constant 0 : i32
    return %c0_i32, %c0_i32_0 : i32, i32
  }
  func.func @transform_4(%arg0: i32, %arg1: i32) -> (i32, i32) {
    %c0_i32 = arith.constant 0 : i32
    %c0_i32_0 = arith.constant 0 : i32
    %c0_i32_1 = arith.constant 0 : i32
    return %c0_i32, %c0_i32_0 : i32, i32
  }
  func.func @transform_5(%arg0: i32, %arg1: i32) -> (i32, i32) {
    %c0_i32 = arith.constant 0 : i32
    %c0_i32_0 = arith.constant 0 : i32
    %c0_i32_1 = arith.constant 0 : i32
    return %c0_i32, %c0_i32_0 : i32, i32
  }
  func.func @transform_6(%arg0: i32, %arg1: i32) -> (i32, i32) {
    %c0_i32 = arith.constant 0 : i32
    %c0_i32_0 = arith.constant 0 : i32
    %c0_i32_1 = arith.constant 0 : i32
    return %c0_i32, %c0_i32_0 : i32, i32
  }
  func.func @transform_7(%arg0: i32, %arg1: i32) -> (i32, i32) {
    %c0_i32 = arith.constant 0 : i32
    %c0_i32_0 = arith.constant 0 : i32
    %c0_i32_1 = arith.constant 0 : i32
    return %c0_i32, %c0_i32_0 : i32, i32
  }
  func.func @transform_8(%arg0: i32, %arg1: i32) -> (i32, i32) {
    %c0_i32 = arith.constant 0 : i32
    %c0_i32_0 = arith.constant 0 : i32
    %c0_i32_1 = arith.constant 0 : i32
    return %c0_i32, %c0_i32_0 : i32, i32
  }
  func.func @transform_9(%arg0: i32, %arg1: i32) -> (i32, i32) {
    %c0_i32 = arith.constant 0 : i32
    %c0_i32_0 = arith.constant 0 : i32
    %c0_i32_1 = arith.constant 0 : i32
    return %c0_i32, %c0_i32_0 : i32, i32
  }
  func.func @transform_10(%arg0: i32, %arg1: i32) -> (i32, i32) {
    %c0_i32 = arith.constant 0 : i32
    %c0_i32_0 = arith.constant 0 : i32
    %c0_i32_1 = arith.constant 0 : i32
    return %c0_i32, %c0_i32_0 : i32, i32
  }
  func.func @transform_11(%arg0: i32, %arg1: i32) -> (i32, i32) {
    %c0_i32 = arith.constant 0 : i32
    %c0_i32_0 = arith.constant 0 : i32
    %c0_i32_1 = arith.constant 0 : i32
    return %c0_i32, %c0_i32_0 : i32, i32
  }
  func.func @transform_12(%arg0: i32, %arg1: i32) -> (i32, i32) {
    %c0_i32 = arith.constant 0 : i32
    %c0_i32_0 = arith.constant 0 : i32
    %c0_i32_1 = arith.constant 0 : i32
    return %c0_i32, %c0_i32_0 : i32, i32
  }
  func.func @transform_13(%arg0: i32, %arg1: i32) -> (i32, i32, i32, i32) {
    %c0_i32 = arith.constant 0 : i32
    %c0_i32_0 = arith.constant 0 : i32
    %c0_i32_1 = arith.constant 0 : i32
    return %arg0, %c0_i32, %arg1, %c0_i32_0 : i32, i32, i32, i32
  }
}

</mosaic_0001>

<bundles_post_ra>
// kernel: diff_jpeg_forward.1
= control target key start
LH: loop header
LB: loop body
LE: loop exit
PB: predicated region body
PF: predicated region fallthrough
CT: control target
= control target key end

     0   :  { %s3944_s0 = inlined_call_operand.hbm [shape: f32[2,3,64,64], index: 0, kind: input, shape index: {}]   ;;  %s3945_s1 = inlined_call_operand.hbm [shape: f32[64,64], index: 1, kind: input, shape index: {}, may-alias: {1,4}]   ;;  %s3946_s2 = inlined_call_operand.hbm [shape: f32[64,64], index: 2, kind: input, shape index: {}, may-alias: {2,3}]   ;;  %s3947_s3 = inlined_call_operand.hbm [shape: f32[64,64], index: 3, kind: input, shape index: {}, may-alias: {2,3}]   ;;  %s3948_s4 = inlined_call_operand.hbm [shape: f32[64,64], index: 4, kind: input, shape index: {}, may-alias: {1,4}]   ;;  %s3949_s5 = inlined_call_operand.hbm [shape: f32[32,64], index: 5, kind: input, shape index: {}]   ;;  %s3950_s6 = inlined_call_operand.hbm [shape: f32[64,32], index: 6, kind: input, shape index: {}]   ;;  %s3951_s7 = inlined_call_operand.hbm [shape: f32[64,32], index: 7, kind: input, shape index: {}]   ;;  %s3952_s8 = inlined_call_operand.hbm [shape: f32[32,64], index: 8, kind: input, shape index: {}]   ;;  %s3953_s9 = inlined_call_operand.hbm [shape: f32[64,64], index: 9, kind: input, shape index: {}]   ;;  %s3954_s10 = inlined_call_operand.hbm [shape: f32[64,64], index: 10, kind: input, shape index: {}]   ;;  %s3955_s11 = inlined_call_operand.hbm [shape: f32[32,32], index: 11, kind: input, shape index: {}]   ;;  %s3956_s12 = inlined_call_operand.hbm [shape: f32[32,32], index: 12, kind: input, shape index: {}]   ;;  %s3957_s13 = inlined_call_operand.hbm [shape: f32[2,3,64,64], index: 13, kind: output, shape index: {}]  }
   0x1   :  { %3963 = sst [smem:[#allocation34_spill]] %s3944_s0 }
   0x2   :  { %3964 = sst [smem:[#allocation35_spill]] %s3945_s1 }
   0x3   :  { %3965 = sst [smem:[#allocation36_spill]] %s3946_s2 }
   0x4   :  { %3966 = sst [smem:[#allocation37_spill]] %s3947_s3 }
   0x5   :  { %3967 = sst [smem:[#allocation38_spill]] %s3948_s4 }
   0x6   :  { %3968 = sst [smem:[#allocation39_spill]] %s3949_s5 }
   0x7   :  { %3969 = sst [smem:[#allocation40_spill]] %s3950_s6 }
   0x8   :  { %3970 = sst [smem:[#allocation41_spill]] %s3951_s7 }
   0x9   :  { %3971 = sst [smem:[#allocation42_spill]] %s3952_s8 }
   0xa   :  { %3972 = sst [smem:[#allocation43_spill]] %s3957_s13 }
   0xb   :  { %18 = vsyncpa [#allocation3], 0 }
   0xc   :  { %20 = vsyncpa [#allocation3 + $0x1], 0 }
   0xd   :  { %21 = vsyncpa [#allocation6], 0 }
   0xe   :  { %22 = vsyncpa [#allocation9], 0 }
   0xf   :  { %23 = vsyncpa [#allocation12], 0 }
  0x10   :  { %24 = vsyncpa [#allocation15], 0 }
  0x11   :  { %25 = vsyncpa [#allocation18], 0 }
  0x12   :  { %26 = vsyncpa [#allocation21], 0 }
  0x13   :  { %27 = vsyncpa [#allocation4], 0 }
  0x14   :  { %29 = vsyncpa [#allocation4 + $0x1], 0  ;;  %s3144_s25 = smov 0   ;;  %s3146_s26 = smov 0  }
  0x15   :  { %s3148_s27 = smov 0   ;;  %s3150_s28 = smov 0  }
  0x16   :  { %s3152_s29 = smov 0   ;;  %s3154_s30 = smov 0  }
  0x17 LB: > { %3973 = sst [smem:[#allocation32_spill]] %s3048_s28  ;;  %s3958_s14 = sadd.s32 4294967295, %s3056_s30   ;;  %s3056_s30 = sphi %s3154_s30, %s35_s30   ;;  %s3052_s29 = sphi %s3152_s29, %s4007_s29   ;;  %s3048_s28 = sphi %s3150_s28, %s4006_s28   ;;  %s3044_s27 = sphi %s3148_s27, %s4005_s27   ;;  %s3040_s26 = sphi %s3146_s26, %s4004_s26   ;;  %s3036_s25 = sphi %s3144_s25, %s4003_s25  }
  0x18   : > { %p2082_p0 = scmp.ge.s32.totalorder %s3056_s30, 1  ;;  %p3178_p1 = scmp.eq.s32.totalorder %s3958_s14, 0 }
  0x19   : > { %p360_p2 = scmp.lt.s32.totalorder %s3056_s30, 3  ;;  %s3975_s1 = sld [smem:[#allocation35_spill]] }
  0x1a   : > { %s3058_s20 = smov [#allocation5]   ;;  %p2095_p6 = scmp.ge.s32.totalorder %s3056_s30, 2 }
  0x1b   : > { %p3186_p3 = pnand %p2082_p0, %p360_p2  ;;  %s373_s21 = sshll.u32 %s3058_s20, 4  ;;  %s374_s21 = int_to_ptr.vmem [resolvable:$true] %s373_s21 }
  0x1c   : > { %s3979_s3 = sld [smem:[#allocation37_spill]]  ;;  %s3961_s17 = smov 128  }
  0x1d   : > { %s3976_s19 = scalar_select %p3186_p3, 1, 0 }
  0x1e   : > { %p2425_p4 = pneg %p3186_p3  ;;  %s3962_s14 = smov 8  }
  0x1f   : > { %s371_s18 = sshll.u32 %s3975_s1, 4  ;;  %3977 = sst [smem:[#allocation33_spill]] %s3976_s19  ;;  %s372_s18 = int_to_ptr.hbm [resolvable:$true] %s371_s18 }
  0x20   : > { %p3194_p5 = pnand %p2425_p4, %p3178_p1  ;;  %s3061_s20 = smov [#allocation8]  }
  0x21   : > { %s401_s1 = sshll.u32 %s3061_s20, 4  ;;  %s3980_s5 = sld [smem:[#allocation39_spill]]  ;;  %s402_s1 = int_to_ptr.vmem [resolvable:$true] %s401_s1 }
  0x22   : > { %s399_s16 = sshll.u32 %s3979_s3, 4  ;;  %s3981_s7 = sld [smem:[#allocation41_spill]]  ;;  %s400_s16 = int_to_ptr.hbm [resolvable:$true] %s399_s16 }
  0x23   : > { %2428 = dma.hbm_to_vmem [thread:$0]  (!%p3194_p5), %s372_s18, 1024, %s374_s21, [#allocation6], %s3961_s17, %s3961_s17, %s3962_s14  }
  0x24   : > { %2434 = dma.hbm_to_vmem [thread:$0]  (!%p3194_p5), %s400_s16, 1024, %s402_s1, [#allocation9], %s3961_s17, %s3961_s17, %s3962_s14  }
  0x25   : > { %s3062_s0 = smov [#allocation11]   ;;  %s3063_s13 = smov [#allocation14]  }
  0x26   : > { %s429_s18 = sshll.u32 %s3062_s0, 4  ;;  %s457_s28 = sshll.u32 %s3063_s13, 4  ;;  %s430_s18 = int_to_ptr.vmem [resolvable:$true] %s429_s18  ;;  %s458_s28 = int_to_ptr.vmem [resolvable:$true] %s457_s28 }
  0x27   : > { %s427_s19 = sshll.u32 %s3980_s5, 4  ;;  %s483_s1 = sshll.u32 %s3953_s9, 4  ;;  %s428_s19 = int_to_ptr.hbm [resolvable:$true] %s427_s19  ;;  %s484_s1 = int_to_ptr.hbm [resolvable:$true] %s483_s1 }
  0x28   : > { %s455_s3 = sshll.u32 %s3981_s7, 4  ;;  %s511_s23 = sshll.u32 %s3955_s11, 4  ;;  %s456_s3 = int_to_ptr.hbm [resolvable:$true] %s455_s3  ;;  %s512_s23 = int_to_ptr.hbm [resolvable:$true] %s511_s23 }
  0x29   : > { %2440 = dma.hbm_to_vmem [thread:$0]  (!%p3194_p5), %s428_s19, 512, %s430_s18, [#allocation12], %s3961_s17, %s3961_s17, %s3962_s14  }
  0x2a   : > { %2446 = dma.hbm_to_vmem [thread:$0]  (!%p3194_p5), %s456_s3, 1024, %s458_s28, [#allocation15], %s3961_s17, %s3961_s17, %s3962_s14  }
  0x2b   : > { %s3064_s24 = smov [#allocation17]   ;;  %s3065_s18 = smov [#allocation20]  }
  0x2c   : > { %s485_s19 = sshll.u32 %s3064_s24, 4  ;;  %s513_s13 = sshll.u32 %s3065_s18, 4  ;;  %s486_s19 = int_to_ptr.vmem [resolvable:$true] %s485_s19  ;;  %s514_s13 = int_to_ptr.vmem [resolvable:$true] %s513_s13 }
  0x2d   : > { %2452 = dma.hbm_to_vmem [thread:$0]  (!%p3194_p5), %s484_s1, 1024, %s486_s19, [#allocation18], %s3961_s17, %s3961_s17, %s3962_s14  }
  0x2e   : > { %s3982_s2 = sld [smem:[#allocation36_spill]]  ;;  %s3066_s24 = smov [#allocation7]  }
  0x2f   : > { %2458 = dma.hbm_to_vmem [thread:$0]  (!%p3194_p5), %s512_s23, 512, %s514_s13, [#allocation21], %s3961_s17, %s3961_s17, %s3962_s14  }
  0x30   : > { %s3983_s4 = sld [smem:[#allocation38_spill]]  ;;  %s387_s1 = sshll.u32 %s3066_s24, 4  ;;  %s388_s1 = int_to_ptr.vmem [resolvable:$true] %s387_s1 }
  0x31   : > { %s3067_s19 = smov [#allocation10]   ;;  %s3984_s6 = sld [smem:[#allocation40_spill]] }
  0x32   : > { %s415_s18 = sshll.u32 %s3067_s19, 4  ;;  %s3985_s8 = sld [smem:[#allocation42_spill]]  ;;  %s416_s18 = int_to_ptr.vmem [resolvable:$true] %s415_s18 }
  0x33   : > { %s3068_s24 = smov [#allocation13]   ;;  %s525_s13 = sshll.u32 %s3956_s12, 4  ;;  %s526_s13 = int_to_ptr.hbm [resolvable:$true] %s525_s13 }
  0x34   : > { %s385_s3 = sshll.u32 %s3982_s2, 4  ;;  %s3070_s28 = smov [#allocation19]   ;;  %s386_s3 = int_to_ptr.hbm [resolvable:$true] %s385_s3 }
  0x35   : > { %2431 = dma.hbm_to_vmem [thread:$0]  (!%p3194_p5), %s386_s3, 1024, %s388_s1, [#allocation6], %s3961_s17, %s3961_s17, %s3962_s14  }
  0x36   : > { %s413_s16 = sshll.u32 %s3983_s4, 4  ;;  %s443_s3 = sshll.u32 %s3068_s24, 4  ;;  %s414_s16 = int_to_ptr.hbm [resolvable:$true] %s413_s16  ;;  %s444_s3 = int_to_ptr.vmem [resolvable:$true] %s443_s3 }
  0x37   : > { %s441_s23 = sshll.u32 %s3984_s6, 4  ;;  %s3069_s1 = smov [#allocation16]   ;;  %s442_s23 = int_to_ptr.hbm [resolvable:$true] %s441_s23 }
  0x38   : > { %2437 = dma.hbm_to_vmem [thread:$0]  (!%p3194_p5), %s414_s16, 1024, %s416_s18, [#allocation9], %s3961_s17, %s3961_s17, %s3962_s14  }
  0x39   : > { %s469_s0 = sshll.u32 %s3985_s8, 4  ;;  %s471_s19 = sshll.u32 %s3069_s1, 4  ;;  %s470_s0 = int_to_ptr.hbm [resolvable:$true] %s469_s0  ;;  %s472_s19 = int_to_ptr.vmem [resolvable:$true] %s471_s19 }
  0x3a   : > { %2443 = dma.hbm_to_vmem [thread:$0]  (!%p3194_p5), %s442_s23, 1024, %s444_s3, [#allocation12], %s3961_s17, %s3961_s17, %s3962_s14  }
  0x3b   : > { %s497_s18 = sshll.u32 %s3954_s10, 4  ;;  %s499_s24 = sshll.u32 %s3070_s28, 4  ;;  %s498_s18 = int_to_ptr.hbm [resolvable:$true] %s497_s18  ;;  %s500_s24 = int_to_ptr.vmem [resolvable:$true] %s499_s24 }
  0x3c   : > { %2449 = dma.hbm_to_vmem [thread:$0]  (!%p3194_p5), %s470_s0, 512, %s472_s19, [#allocation15], %s3961_s17, %s3961_s17, %s3962_s14  }
  0x3d   : > { %2455 = dma.hbm_to_vmem [thread:$0]  (!%p3194_p5), %s498_s18, 1024, %s500_s24, [#allocation18], %s3961_s17, %s3961_s17, %s3962_s14  }
  0x3e   : > { %s3071_s3 = smov [#allocation22]   ;;  %s2081_s1 = sadd.s32 4294967294, %s3056_s30  }
  0x3f   : > { %s527_s0 = sshll.u32 %s3071_s3, 4  ;;  %s47_s19 = sadd.s32 1, %s3052_s29  ;;  %s528_s0 = int_to_ptr.vmem [resolvable:$true] %s527_s0 }
  0x40   : > { %2461 = dma.hbm_to_vmem [thread:$0]  (!%p3194_p5), %s526_s13, 512, %s528_s0, [#allocation21], %s3961_s17, %s3961_s17, %s3962_s14  }
  0x41   : > { %p49_p7 = scmp.ge.s32.totalorder %s47_s19, 2  ;;  %s56_s21 = sadd.s32 1, %s3044_s27 }
  0x42   : > { %p63_p8 = scmp.ne.s32.totalorder %s3044_s27, %s3040_s26  ;;  %p64_p9 = scmp.eq.s32.totalorder %s3056_s30, 0 }
  0x43   : > { %s4009_s19 = smov (%p49_p7, %s47_s19), 0  ;;  %p69_p11 = scmp.ne.s32.totalorder %s3040_s26, %s3036_s25 }
  0x44   : > { %p3300_p10 = por %p64_p9, %p63_p8  ;;  %s51_s22 = ssub.s32 %s3052_s29, %s4009_s19 }
  0x45   : > { %s3987_s18 = sadd.s32 4294967295, %s3056_s30   ;;  %p54_p13 = scmp.eq.s32.totalorder %s51_s22, 0 }
  0x46   : > { %p347_p12 = scmp.eq.s32.totalorder %s3987_s18, 1  ;;  %p3312_p0 = por %p3178_p1, %p69_p11 }
  0x47   : > { %p353_p4 = scmp.eq.s32.totalorder %s2081_s1, 1  ;;  %p2482_p7 = scmp.lt.s32.totalorder %s3056_s30, 2 }
  0x48   : > { %p3316_p2 = por %p347_p12, %p63_p8  ;;  %s541_s24 = sand.u32 1, %s3044_s27  }
  0x49   : > { %s3321_s13 = scalar_select %p54_p13, %s3044_s27, %s56_s21  }
  0x4a   : > { %p3323_p5 = por %p353_p4, %p69_p11  ;;  %s2242_s3 = smul.u32 192, %s3052_s29 }
  0x4b   : > { %s2241_s0 = smul.u32 192, %s541_s24  ;;  %s3991_s17 = sld [smem:[#allocation34_spill]] }
  0x4c   : > { %p2463_p8 = pnand %p2482_p7, %p3300_p10  ;;  %s542_s21 = scalar_lea.sflag [#allocation3], %s541_s24 }
  0x4d   : > { %s545_s4 = scalar_lea.vmem [#allocation2], %s2241_s0  ;;  %s3992_s5 = smov 8  }
  0x4e   : > { %s555_s1 = sshll.u32 %s545_s4, 4  ;;  %s3993_s6 = smov 128   ;;  %s556_s1 = int_to_ptr.vmem [resolvable:$true] %s555_s1 }
  0x4f   : > { %567 = sbr.rel (%p3186_p3) target bundleno = 863 (0x35f), region = 72  ;;  %s3341_s8 = sand.u32 (!%p3186_p3), 1, %s3040_s26  }
  0x51   : > { %s552_s14 = scalar_lea.hbm %s3991_s17, %s2242_s3  ;;  %s570_s17 = scalar_lea.sflag (!%p3186_p3), [#allocation3], %s3341_s8 }
  0x52   : > { %s553_s2 = sshll.u32 %s552_s14, 4  ;;  %s2243_s14 = smul.u32 (!%p3186_p3), 192, %s3341_s8  ;;  %s554_s2 = int_to_ptr.hbm [resolvable:$true] %s553_s2 }
  0x53   : > { %2465 = dma.hbm_to_vmem [thread:$0]  (!%p2463_p8), %s554_s2, 3072, %s556_s1, %s542_s21, %s3993_s6, %s3993_s6, %s3992_s5  }
  0x54   : > { %s3347_s4 = scalar_lea.vmem [#allocation2], %s2243_s14 }
  0x55   : > { %3003 = dma.done.wait (%p3312_p0), %s570_s17, 3072  }
  0x56   : > { %3005 = vsyncadd (%p3312_p0), %s570_s17, 4294964224 }
  0x57   : > { %3007 = dma.done.wait (%p3178_p1), [#allocation6], 2048  }
  0x58   : > { %3009 = vsyncadd (%p3178_p1), [#allocation6], 4294965248 }
  0x59   : > { %3011 = dma.done.wait (%p3178_p1), [#allocation9], 2048  }
  0x5a   : > { %3013 = vsyncadd (%p3178_p1), [#allocation9], 4294965248 }
  0x5b   : > { %3015 = dma.done.wait (%p3178_p1), [#allocation12], 1536  }
  0x5c   : > { %3017 = vsyncadd (%p3178_p1), [#allocation12], 4294965760 }
  0x5d   : > { %3019 = dma.done.wait (%p3178_p1), [#allocation15], 1536  }
  0x5e   : > { %3021 = vsyncadd (%p3178_p1), [#allocation15], 4294965760 }
  0x5f   : > { %3023 = dma.done.wait (%p3178_p1), [#allocation18], 2048  }
  0x60   : > { %3025 = vsyncadd (%p3178_p1), [#allocation18], 4294965248 }
  0x61   : > { %3027 = dma.done.wait (%p3178_p1), [#allocation21], 1024  }
  0x62   : > { %3029 = vsyncadd (%p3178_p1), [#allocation21], 4294966272  ;;  %v686_v0 = vld [vmem:[%s3347_s4 + $0x38] sm:$0xff]  ;;  %v685_v6 = vld [vmem:[%s3347_s4 + $0x30] sm:$0xff]  ;;  %vm937_vm0 = vcmask 523264   ;;  %vm1462_vm13 = vcmask 261120  }
  0x63   : > { %v2117_v1 = vld [vmem:[%s3347_s4 + $0x78] sm:$0xff]  ;;  %v3380_v3 = vmul.f32 255.0, %v686_v0  ;;  %v2116_v7 = vld [vmem:[%s3347_s4 + $0x70] sm:$0xff]  ;;  %v3389_v9 = vmul.f32 255.0, %v685_v6  ;;  %v684_v12 = vld [vmem:[%s3347_s4 + $0x28] sm:$0xff]  ;;  %s3796_s2 = scalar_lea.vmem [#allocation23], %s2243_s14 }
  0x64   : > { %v2125_v2 = vld [vmem:[%s3347_s4 + $0xb8] sm:$0xff]  ;;  %v3382_v4 = vmul.f32 255.0, %v2117_v1  ;;  %v2124_v8 = vld [vmem:[%s3347_s4 + $0xb0] sm:$0xff]  ;;  %v3391_v10 = vmul.f32 255.0, %v2116_v7  ;;  %v2115_v13 = vld [vmem:[%s3347_s4 + $0x68] sm:$0xff]  ;;  %v3404_v22 = vmul.f32 255.0, %v684_v12 }
  0x65   : > { %v3384_v5 = vmul.f32 255.0, %v2125_v2  ;;  %v3393_v11 = vmul.f32 255.0, %v2124_v8  ;;  %v2123_v14 = vld [vmem:[%s3347_s4 + $0xa8] sm:$0xff]  ;;  %v736_v15 = vmul.f32 0.299, %v3380_v3  ;;  %v3406_v23 = vmul.f32 255.0, %v2115_v13 }
  0x66   : > { %v744_v16 = vmul.f32 0.587, %v3382_v4  ;;  %v735_v18 = vmul.f32 0.299, %v3389_v9  ;;  %v743_v19 = vmul.f32 0.587, %v3391_v10 }
  0x67   : > { %v760_v17 = vmul.f32 0.114, %v3384_v5  ;;  %v759_v20 = vmul.f32 0.114, %v3393_v11  ;;  %v3408_v24 = vmul.f32 255.0, %v2123_v14  ;;  %v683_v25 = vld [vmem:[%s3347_s4 + $0x20] sm:$0xff] }
  0x68   : > { %v752_v21 = vadd.f32 %v744_v16, %v736_v15  ;;  %v2114_v26 = vld [vmem:[%s3347_s4 + $0x60] sm:$0xff]  ;;  %v751_v28 = vadd.f32 %v743_v19, %v735_v18  ;;  %v3413_v29 = vmul.f32 255.0, %v683_v25  ;;  %v682_v32 = vld [vmem:[%s3347_s4 + $0x18] sm:$0xff]  ;;  %v734_v36 = vmul.f32 0.299, %v3404_v22  ;;  %v681_v47 = vld [vmem:[%s3347_s4 + $0x10] sm:$0xff] }
  0x69   : > { %v2122_v27 = vld [vmem:[%s3347_s4 + $0xa0] sm:$0xff]  ;;  %v3415_v30 = vmul.f32 255.0, %v2114_v26  ;;  %v2113_v33 = vld [vmem:[%s3347_s4 + $0x58] sm:$0xff]  ;;  %v742_v37 = vmul.f32 0.587, %v3406_v23  ;;  %v3428_v45 = vmul.f32 255.0, %v682_v32 }
  0x6a   : > { %v3417_v31 = vmul.f32 255.0, %v2122_v27  ;;  %v2121_v34 = vld [vmem:[%s3347_s4 + $0x98] sm:$0xff]  ;;  %v768_v35 = vadd.f32 %v760_v17, %v752_v21  ;;  %v758_v38 = vmul.f32 0.114, %v3408_v24  ;;  %v767_v39 = vadd.f32 %v759_v20, %v751_v28  ;;  %v2112_v48 = vld [vmem:[%s3347_s4 + $0x50] sm:$0xff]  ;;  %v680_v54 = vld [vmem:[%s3347_s4 + $0x8] sm:$0xff] }
  0x6b   : > { %v733_v40 = vmul.f32 0.299, %v3413_v29  ;;  %v741_v41 = vmul.f32 0.587, %v3415_v30  ;;  %v750_v44 = vadd.f32 %v742_v37, %v734_v36  ;;  %v3430_v46 = vmul.f32 255.0, %v2113_v33  ;;  %v2120_v49 = vld [vmem:[%s3347_s4 + $0x90] sm:$0xff] }
  0x6c   : > { %v757_v42 = vmul.f32 0.114, %v3417_v31  ;;  %v2133_v43 = vadd.f32 -128.0, %v768_v35  ;;  %v2132_v50 = vadd.f32 -128.0, %v767_v39  ;;  %v3435_v52 = vmul.f32 255.0, %v2121_v34  ;;  %v2111_v55 = vld [vmem:[%s3347_s4 + $0x48] sm:$0xff] }
  0x6d   : > { %v749_v51 = vadd.f32 %v741_v41, %v733_v40  ;;  %v3437_v53 = vmul.f32 255.0, %v681_v47  ;;  %v766_v56 = vadd.f32 %v758_v38, %v750_v44  ;;  %v732_v57 = vmul.f32 0.299, %v3428_v45  ;;  %v2119_v60 = vld [vmem:[%s3347_s4 + $0x88] sm:$0xff]  ;;  %v679_v1 = vld [vmem:[%s3347_s4] sm:$0xff]  ;;  %s4001_s5 = sld [smem:[#allocation32_spill]] }
  0x6e   : > { %970 = vmatpush.msra.mxu0 %v2133_v43  ;;  %v740_v58 = vmul.f32 0.587, %v3430_v46  ;;  %2233 = vmatpush.msra.mxu2 %v2133_v43  ;;  %v3443_v59 = vmul.f32 255.0, %v2112_v48  ;;  %v756_v62 = vmul.f32 0.114, %v3435_v52  ;;  %v3447_v63 = vmul.f32 255.0, %v2120_v49 }
  0x6f   : > { %v765_v61 = vadd.f32 %v757_v42, %v749_v51  ;;  %v731_v0 = vmul.f32 0.299, %v3437_v53  ;;  %v2131_v2 = vadd.f32 -128.0, %v766_v56  ;;  %v3452_v8 = vmul.f32 255.0, %v680_v54  ;;  %v2110_v12 = vld [vmem:[%s3347_s4 + $0x40] sm:$0xff]  ;;  %s4002_s16 = sld [smem:[#allocation43_spill]] }
  0x70   : > { %971 = vmatpush.msra.mxu0 %v2132_v50  ;;  %v748_v6 = vadd.f32 %v740_v58, %v732_v57  ;;  %v739_v7 = vmul.f32 0.587, %v3443_v59  ;;  %2234 = vmatpush.msra.mxu2 %v2132_v50  ;;  %v2118_v13 = vld [vmem:[%s3347_s4 + $0x80] sm:$0xff]  ;;  %v755_v15 = vmul.f32 0.114, %v3447_v63  ;;  %v3457_v16 = vmul.f32 255.0, %v2111_v55 }
  0x71   : > { %v2130_v14 = vadd.f32 -128.0, %v765_v61  ;;  %v3459_v17 = vmul.f32 255.0, %v2119_v60  ;;  %v730_v20 = vmul.f32 0.299, %v3452_v8  ;;  %v3462_v21 = vmul.f32 255.0, %v679_v1  ;;  %v857_v61 = vld [vmem:[#allocation5] sm:$0xff] }
  0x72   : > { %972 = vmatpush.msra.mxu0 %v2131_v2  ;;  %v764_v18 = vadd.f32 %v756_v62, %v748_v6  ;;  %v747_v19 = vadd.f32 %v739_v7, %v731_v0  ;;  %2235 = vmatpush.msra.mxu2 %v2131_v2  ;;  %v738_v25 = vmul.f32 0.587, %v3457_v16  ;;  %v3466_v27 = vmul.f32 255.0, %v2110_v12  ;;  %s1876_s24 = sshll.u32 %s3796_s2, 4  ;;  %s1862_s0 = scalar_lea.sflag [#allocation4], %s3341_s8  ;;  %s1877_s24 = int_to_ptr.vmem [resolvable:$true] %s1876_s24 }
  0x73   : > { %v754_v26 = vmul.f32 0.114, %v3459_v17  ;;  %v3468_v28 = vmul.f32 255.0, %v2118_v13  ;;  %v729_v34 = vmul.f32 0.299, %v3462_v21  ;;  %v808_v41 = vmul.f32 0.5, %v3384_v5 }
  0x74   : > { %973 = vmatpush.msra.mxu0 %v2130_v14  ;;  %v2129_v32 = vadd.f32 -128.0, %v764_v18  ;;  %v763_v33 = vadd.f32 %v755_v15, %v747_v19  ;;  %2236 = vmatpush.msra.mxu2 %v2130_v14  ;;  %v784_v35 = vmul.f32 -0.168736, %v3380_v3  ;;  %v746_v36 = vadd.f32 %v738_v25, %v730_v20  ;;  %s2372_s6 = smul.u32 192, %s4001_s5 }
  0x75   : > { %v737_v37 = vmul.f32 0.587, %v3466_v27  ;;  %v753_v38 = vmul.f32 0.114, %v3468_v28  ;;  %v792_v39 = vmul.f32 0.331264, %v3382_v4 }
  0x76   : > { %974 = vmatpush.msra.mxu0 %v2129_v32  ;;  %v2128_v40 = vadd.f32 -128.0, %v763_v33  ;;  %2237 = vmatpush.msra.mxu2 %v2129_v32  ;;  %v783_v42 = vmul.f32 -0.168736, %v3389_v9  ;;  %v807_v43 = vmul.f32 0.5, %v3393_v11  ;;  %v762_v44 = vadd.f32 %v754_v26, %v746_v36  ;;  %s1875_s20 = scalar_lea.hbm %s4002_s16, %s2372_s6  ;;  %s2970_s14 = scalar_lea.hbm %s4002_s16, 384 }
  0x77   : > { %v745_v47 = vadd.f32 %v737_v37, %v729_v34  ;;  %v800_v48 = vsub.f32 %v784_v35, %v792_v39  ;;  %v791_v49 = vmul.f32 0.331264, %v3391_v10  ;;  %v824_v50 = vmul.f32 0.5, %v3380_v3  ;;  %s1878_s3 = sshll.u32 %s1875_s20, 4  ;;  %s1879_s3 = int_to_ptr.hbm [resolvable:$true] %s1878_s3 }
  0x78   : > { %975 = vmatpush.msra.mxu0 %v2128_v40  ;;  %2238 = vmatpush.msra.mxu2 %v2128_v40  ;;  %v832_v51 = vmul.f32 0.418688, %v3382_v4  ;;  %v848_v54 = vmul.f32 0.081312, %v3384_v5  ;;  %v806_v55 = vmul.f32 0.5, %v3408_v24  ;;  %v2127_v56 = vadd.f32 -128.0, %v762_v44 }
  0x79   : > { %v761_v57 = vadd.f32 %v753_v38, %v745_v47  ;;  %v816_v58 = vadd.f32 %v808_v41, %v800_v48  ;;  %v799_v60 = vsub.f32 %v783_v42, %v791_v49  ;;  %v782_v0 = vmul.f32 -0.168736, %v3404_v22  ;;  %v861_v4 = vld [vmem:[#allocation5 + $0x20] sm:$0xff]  ;;  %v862_v47 = vld [vmem:[#allocation5 + $0x28] sm:$0xff]  ;;  %s2964_s22 = sshra.s32 %s1879_s3, 4  ;;  %s2965_s22 = int_to_ptr.hbm [resolvable:$true] %s2964_s22 }
  0x7a   : > { %v840_v62 = vsub.f32 %v824_v50, %v832_v51  ;;  %v790_v1 = vmul.f32 0.331264, %v3406_v23  ;;  %v823_v2 = vmul.f32 0.5, %v3389_v9  ;;  %976 = vmatpush.msra.mxu0 %v2127_v56  ;;  %2239 = vmatpush.msra.mxu2 %v2127_v56  ;;  %v831_v5 = vmul.f32 0.418688, %v3391_v10  ;;  %s2966_s18 = scalar_lea.hbm %s2965_s22, 192  ;;  %p2971_p10 = scmp.lt.s32.totalorder %s2965_s22, %s4002_s16 }
  0x7b   : > { %v2126_v3 = vadd.f32 -128.0, %v761_v57  ;;  %v815_v6 = vadd.f32 %v807_v43, %v799_v60  ;;  %v847_v7 = vmul.f32 0.081312, %v3393_v11  ;;  %1023 = vmatpush.msra.mxu3 %v816_v58  ;;  %v781_v14 = vmul.f32 -0.168736, %v3413_v29  ;;  %p2967_p1 = scmp.ne.s32.totalorder %s2965_s22, %s2966_s18  ;;  %p2972_p11 = scmp.lt.s32.totalorder %s2970_s14, %s2966_s18 }
  0x7c   : > { %v856_v12 = vsub.f32 %v840_v62, %v848_v54  ;;  %v798_v13 = vsub.f32 %v782_v0, %v790_v1  ;;  %v789_v15 = vmul.f32 0.331264, %v3415_v30  ;;  %v839_v18 = vsub.f32 %v823_v2, %v831_v5 }
  0x7d   : > { %977 = vmatpush.msra.mxu0 %v2126_v3  ;;  %2240 = vmatpush.msra.mxu2 %v2126_v3  ;;  %v805_v9 = vmul.f32 0.5, %v3417_v31  ;;  %v822_v19 = vmul.f32 0.5, %v3404_v22  ;;  %v830_v20 = vmul.f32 0.418688, %v3406_v23  ;;  %v846_v25 = vmul.f32 0.081312, %v3408_v24  ;;  %p2968_p3 = pnand %p2967_p1, %p3316_p2  ;;  %p2973_p12 = por %p2972_p11, %p2971_p10 }
  0x7e   : > { %2134 = vmatmul.msk.f32.vlgmr.msra.gmra.mxu0 %vm937_vm0, %v857_v61  ;;  %2138 = vmatmul.msk.f32.vlgmr.msra.gmra.mxu2 %vm937_vm0, %v861_v4  ;;  %v814_v10 = vadd.f32 %v806_v55, %v798_v13  ;;  %v797_v11 = vsub.f32 %v781_v14, %v789_v15  ;;  %v780_v26 = vmul.f32 -0.168736, %v3428_v45  ;;  %v855_v32 = vsub.f32 %v839_v18, %v847_v7  ;;  %v889_v13 = vld [vmem:[#allocation11] sm:$0xff]  ;;  %v859_v14 = vld [vmem:[#allocation5 + $0x10] sm:$0xff]  ;;  %v872_v18 = vld [vmem:[#allocation7 + $0x38] sm:$0xff] }
  0x7f   : > { %1024 = vmatpush.msra.mxu3 %v815_v6  ;;  %1052 = vmatpush.msrb.mxu2 %v856_v12  ;;  %v838_v33 = vsub.f32 %v822_v19, %v830_v20  ;;  %v788_v34 = vmul.f32 0.331264, %v3430_v46  ;;  %v804_v22 = vmul.f32 0.5, %v3435_v52  ;;  %v821_v23 = vmul.f32 0.5, %v3413_v29  ;;  %v858_v29 = vld [vmem:[#allocation5 + $0x8] sm:$0xff]  ;;  %v891_v20 = vld [vmem:[#allocation11 + $0x10] sm:$0xff]  ;;  %p2969_p9 = pneg %p2968_p3 }
  0x80   : > { %v813_v35 = vadd.f32 %v805_v9, %v797_v11  ;;  %v829_v36 = vmul.f32 0.418688, %v3415_v30  ;;  %v845_v37 = vmul.f32 0.081312, %v3417_v31  ;;  %v779_v39 = vmul.f32 -0.168736, %v3437_v53 }
  0x81   : > { %1025 = vmatpush.msra.mxu3 %v814_v10  ;;  %1053 = vmatpush.msrb.mxu2 %v855_v32  ;;  %v854_v24 = vsub.f32 %v838_v33, %v846_v25  ;;  %v796_v38 = vsub.f32 %v780_v26, %v788_v34  ;;  %v787_v40 = vmul.f32 0.331264, %v3443_v59  ;;  %v803_v42 = vmul.f32 0.5, %v3447_v63  ;;  %v871_v9 = vld [vmem:[#allocation7 + $0x30] sm:$0xff]  ;;  %v870_v19 = vld [vmem:[#allocation7 + $0x28] sm:$0xff]  ;;  %v869_v10 = vld [vmem:[#allocation7 + $0x20] sm:$0xff]  ;;  %p2974_p13 = pnand %p2973_p12, %p2969_p9 }
  0x82   : > { %v837_v41 = vsub.f32 %v821_v23, %v829_v36  ;;  %v820_v43 = vmul.f32 0.5, %v3428_v45  ;;  %v828_v44 = vmul.f32 0.418688, %v3430_v46  ;;  %v844_v48 = vmul.f32 0.081312, %v3435_v52  ;;  %v868_v11 = vld [vmem:[#allocation7 + $0x18] sm:$0xff] }
  0x83   : > { %1026 = vmatpush.msra.mxu3 %v813_v35  ;;  %1054 = vmatpush.msrb.mxu2 %v854_v24  ;;  %v812_v30 = vadd.f32 %v804_v22, %v796_v38  ;;  %v795_v31 = vsub.f32 %v779_v39, %v787_v40  ;;  %v778_v49 = vmul.f32 -0.168736, %v3452_v8  ;;  %v786_v54 = vmul.f32 0.331264, %v3457_v16  ;;  %v867_v25 = vld [vmem:[#allocation7 + $0x10] sm:$0xff]  ;;  %v866_v26 = vld [vmem:[#allocation7 + $0x8] sm:$0xff] }
  0x84   : > { %v853_v50 = vsub.f32 %v837_v41, %v845_v37  ;;  %v836_v51 = vsub.f32 %v820_v43, %v828_v44  ;;  %v802_v55 = vmul.f32 0.5, %v3459_v17  ;;  %v819_v46 = vmul.f32 0.5, %v3437_v53  ;;  %v892_v32 = vld [vmem:[#allocation11 + $0x18] sm:$0xff]  ;;  %v865_v33 = vld [vmem:[#allocation7] sm:$0xff]  ;;  %v899_v22 = vld [vmem:[#allocation13 + $0x30] sm:$0xff] }
  0x85   : > { %1027 = vmatpush.msra.mxu3 %v812_v30  ;;  %v811_v45 = vadd.f32 %v803_v42, %v795_v31  ;;  %v827_v56 = vmul.f32 0.418688, %v3443_v59  ;;  %v843_v57 = vmul.f32 0.081312, %v3447_v63  ;;  %v794_v58 = vsub.f32 %v778_v49, %v786_v54  ;;  %v900_v34 = vld [vmem:[#allocation13 + $0x38] sm:$0xff]  ;;  %v898_v35 = vld [vmem:[#allocation13 + $0x28] sm:$0xff] }
  0x86   : > { %2135 = vmatmul.msk.f32.gmra.mxu0 %vm937_vm0, %v858_v29  ;;  %2139 = vmatmul.msk.f32.gmra.mxu2 %vm937_vm0, %v862_v47  ;;  %v852_v52 = vsub.f32 %v836_v51, %v844_v48  ;;  %v777_v60 = vmul.f32 -0.168736, %v3462_v21  ;;  %v785_v61 = vmul.f32 0.331264, %v3466_v27  ;;  %v801_v0 = vmul.f32 0.5, %v3468_v28  ;;  %v897_v23 = vld [vmem:[#allocation13 + $0x20] sm:$0xff] }
  0x87   : > { %1055 = vmatpush.msrb.mxu2 %v853_v50  ;;  %1028 = vmatpush.msra.mxu3 %v811_v45  ;;  %v835_v62 = vsub.f32 %v819_v46, %v827_v56  ;;  %v818_v53 = vmul.f32 0.5, %v3452_v8  ;;  %v826_v59 = vmul.f32 0.418688, %v3457_v16  ;;  %v810_v63 = vadd.f32 %v802_v55, %v794_v58  ;;  %v863_v8 = vld [vmem:[#allocation5 + $0x30] sm:$0xff]  ;;  %v896_v36 = vld [vmem:[#allocation13 + $0x18] sm:$0xff]  ;;  %v894_v24 = vld [vmem:[#allocation13 + $0x8] sm:$0xff] }
  0x88   : > { %v793_v1 = vsub.f32 %v777_v60, %v785_v61  ;;  %v842_v2 = vmul.f32 0.081312, %v3459_v17  ;;  %v817_v3 = vmul.f32 0.5, %v3462_v21  ;;  %v825_v5 = vmul.f32 0.418688, %v3466_v27  ;;  %v890_v21 = vld [vmem:[#allocation11 + $0x8] sm:$0xff]  ;;  %1166 = vmatpush.msra.mxu1 %v900_v34 }
  0x89   : > { %1056 = vmatpush.msrb.mxu2 %v852_v52  ;;  %v851_v4 = vsub.f32 %v835_v62, %v843_v57  ;;  %v834_v6 = vsub.f32 %v818_v53, %v826_v59  ;;  %v841_v7 = vmul.f32 0.081312, %v3468_v28  ;;  %1029 = vmatpush.msra.mxu3 %v810_v63  ;;  %v860_v27 = vld [vmem:[#allocation5 + $0x18] sm:$0xff]  ;;  %v895_v37 = vld [vmem:[#allocation13 + $0x10] sm:$0xff]  ;;  %v893_v39 = vld [vmem:[#allocation13] sm:$0xff] }
  0x8a   : > { %v809_v12 = vadd.f32 %v801_v0, %v793_v1  ;;  %v833_v15 = vsub.f32 %v817_v3, %v825_v5  ;;  %v864_v28 = vld [vmem:[#allocation5 + $0x38] sm:$0xff]  ;;  %1167 = vmatpush.msra.mxu1 %v899_v22  ;;  %v913_v56 = vld [vmem:[#allocation17] sm:$0xff]  ;;  %v914_v61 = vld [vmem:[#allocation17 + $0x8] sm:$0xff] }
  0x8b   : > { %1057 = vmatpush.msrb.mxu2 %v851_v4  ;;  %v850_v16 = vsub.f32 %v834_v6, %v842_v2  ;;  %v915_v62 = vld [vmem:[#allocation17 + $0x10] sm:$0xff]  ;;  %v3553_v0 = vld [vmem:[#allocation20 + $0x8] sm:$0xff]  ;;  %v916_v2 = vld [vmem:[#allocation17 + $0x18] sm:$0xff] }
  0x8c   : > { %1030 = vmatpush.msra.mxu3 %v809_v12  ;;  %v849_v17 = vsub.f32 %v833_v15, %v841_v7  ;;  %1168 = vmatpush.msra.mxu1 %v898_v35 }
  0x8d   : > { %2142 = vmatmul.msk.f32.vlgmr.msra.gmra.mxu3 %vm937_vm0, %v889_v13  ;;  %1058 = vmatpush.msrb.mxu2 %v850_v16 }
  0x8e   : > { %2136 = vmatmul.msk.f32.gmra.mxu0 %vm937_vm0, %v859_v14  ;;  %2140 = vmatmul.msk.f32.gmra.mxu2 %vm937_vm0, %v863_v8  ;;  %v3567_v8 = vld [vmem:[#allocation20 + $0x10] sm:$0xff] }
  0x8f   : > { %1059 = vmatpush.msrb.mxu2 %v849_v17  ;;  %1105 = vmatpush.msrb.mxu3 %v872_v18  ;;  %v3569_v17 = vld [vmem:[#allocation20] sm:$0xff] }
  0x90   : > { %1169 = vmatpush.msra.mxu1 %v897_v23 }
  0x91   : > { %1106 = vmatpush.msrb.mxu3 %v871_v9  ;;  %1211 = vmatpush.msra.mxu2 %v900_v34 }
  0x92   : > { %1170 = vmatpush.msra.mxu1 %v896_v36 }
  0x93   : > { %1107 = vmatpush.msrb.mxu3 %v870_v19  ;;  %1212 = vmatpush.msra.mxu2 %v899_v22 }
  0x94   : > { %1171 = vmatpush.msra.mxu1 %v895_v37 }
  0x95   : > { %2143 = vmatmul.msk.f32.gmra.mxu3 %vm937_vm0, %v890_v21  ;;  %1213 = vmatpush.msra.mxu2 %v898_v35 }
  0x96   : > { %2137 = vmatmul.msk.f32.gmra.mxu0 %vm937_vm0, %v860_v27  ;;  %2141 = vmatmul.msk.f32.gmra.mxu2 %vm937_vm0, %v864_v28 }
  0x97   : > { %1108 = vmatpush.msrb.mxu3 %v869_v10  ;;  %1214 = vmatpush.msra.mxu2 %v897_v23  ;;  %v917_v10 = vld [vmem:[#allocation17 + $0x20] sm:$0xff] }
  0x98   : > { %1172 = vmatpush.msra.mxu1 %v894_v24 }
  0x99   : > { %1109 = vmatpush.msrb.mxu3 %v868_v11  ;;  %1215 = vmatpush.msra.mxu2 %v896_v36 }
  0x9a   : > { %1173 = vmatpush.msra.mxu1 %v893_v39 }
  0x9b   : > { %1110 = vmatpush.msrb.mxu3 %v867_v25  ;;  %1216 = vmatpush.msra.mxu2 %v895_v37 }
  0x9d   : > { %2144 = vmatmul.msk.f32.gmra.mxu3 %vm937_vm0, %v891_v20  ;;  %1217 = vmatpush.msra.mxu2 %v894_v24 }
  0x9e   : > { %2146 = vmatmul.msk.f32.vlgmr.msrb.gmra.mxu2 %vm937_vm0, %v889_v13  ;;  %1111 = vmatpush.msrb.mxu3 %v866_v26 }
  0x9f   : > { %1218 = vmatpush.msra.mxu2 %v893_v39 }
  0xa0   : > { %1112 = vmatpush.msrb.mxu3 %v865_v33 }
  0xa5   : > { %2145 = vmatmul.msk.f32.gmra.mxu3 %vm937_vm0, %v892_v32 }
  0xa6   : > { %2147 = vmatmul.msk.f32.gmra.mxu2 %vm937_vm0, %v890_v21 }
  0xae   : > { %2148 = vmatmul.msk.f32.gmra.mxu2 %vm937_vm0, %v891_v20 }
  0xb6   : > { %2149 = vmatmul.msk.f32.gmra.mxu2 %vm937_vm0, %v892_v32 }
  0xfb   : > { %v979_v38 = vpop.f32.mrf.mxu0 }
  0xfc   : > { %2150 = vmatmul.msk.f32.vlgmr.msrb.gmra.mxu3 %vm937_vm0, %v979_v38  ;;  %v3582_v38 = vld [vmem:[#allocation20 + $0x18] sm:$0xff] }
 0x101   : > { %v991_v40 = vpop.f32.mrf.mxu2 }
 0x103   : > { %v982_v41 = vpop.f32.mrf.mxu0 }
 0x104   : > { %2151 = vmatmul.msk.f32.gmra.mxu3 %vm937_vm0, %v982_v41 }
 0x109   : > { %v994_v42 = vpop.f32.mrf.mxu2 }
 0x10b   : > { %v985_v43 = vpop.f32.mrf.mxu0 }
 0x10c   : > { %2152 = vmatmul.msk.f32.gmra.mxu3 %vm937_vm0, %v985_v43  ;;  %v918_v43 = vld [vmem:[#allocation17 + $0x28] sm:$0xff] }
 0x110   : > { %v1032_v44 = vpop.f32.mrf.mxu3 }
 0x111   : > { %v997_v29 = vpop.f32.mrf.mxu2  ;;  %2158 = vmatmul.msk.f32.vlgmr.msra.gmra.mxu1 %vm937_vm0, %v1032_v44 }
 0x113   : > { %v988_v47 = vpop.f32.mrf.mxu0 }
 0x114   : > { %2153 = vmatmul.msk.f32.gmra.mxu3 %vm937_vm0, %v988_v47 }
 0x118   : > { %v1035_v30 = vpop.f32.mrf.mxu3 }
 0x119   : > { %v1000_v31 = vpop.f32.mrf.mxu2  ;;  %2159 = vmatmul.msk.f32.gmra.mxu1 %vm937_vm0, %v1035_v30 }
 0x11c   : > { %2154 = vmatmul.msk.f32.gmra.mxu3 %vm937_vm0, %v991_v40 }
 0x120   : > { %v1038_v48 = vpop.f32.mrf.mxu3 }
 0x121   : > { %v1061_v49 = vpop.f32.mrf.mxu2  ;;  %2160 = vmatmul.msk.f32.gmra.mxu1 %vm937_vm0, %v1038_v48 }
 0x122   : > { %2162 = vmatmul.msk.f32.vlgmr.msra.gmra.mxu2 %vm937_vm0, %v1061_v49 }
 0x124   : > { %2155 = vmatmul.msk.f32.gmra.mxu3 %vm937_vm0, %v994_v42 }
 0x128   : > { %v1041_v50 = vpop.f32.mrf.mxu3 }
 0x129   : > { %v1064_v51 = vpop.f32.mrf.mxu2  ;;  %2161 = vmatmul.msk.f32.gmra.mxu1 %vm937_vm0, %v1041_v50 }
 0x12a   : > { %2163 = vmatmul.msk.f32.gmra.mxu2 %vm937_vm0, %v1064_v51 }
 0x12c   : > { %2156 = vmatmul.msk.f32.gmra.mxu3 %vm937_vm0, %v997_v29 }
 0x131   : > { %v1067_v54 = vpop.f32.mrf.mxu2 }
 0x132   : > { %2164 = vmatmul.msk.f32.gmra.mxu2 %vm937_vm0, %v1067_v54 }
 0x134   : > { %2157 = vmatmul.msk.f32.gmra.mxu3 %vm937_vm0, %v1000_v31 }
 0x139   : > { %v1070_v55 = vpop.f32.mrf.mxu2 }
 0x13a   : > { %2165 = vmatmul.msk.f32.gmra.mxu2 %vm937_vm0, %v1070_v55 }
 0x17f   : > { %v1114_v45 = vpop.f32.mrf.mxu3 }
 0x180   : > { %v1138_v57 = vmul.f32 %v1114_v45, %v913_v56 }
 0x182   : > { %v2246_v60 = vcvt.f32.s32 %v1138_v57  ;;  %v2249_v14 = vand.u32 2147483648, %v1138_v57  ;;  %v2244_v16 = vand.u32 2147483647, %v1138_v57 }
 0x184   : > { %v2247_v53 = vcvt.s32.f32 %v2246_v60  ;;  %vm2245_vm1 = vcmp.lt.f32.partialorder %v2244_v16, 8388608.0 }
 0x186   : > { %v2248_v6 = vand.u32 2147483647, %v2247_v53 }
 0x187   : > { %v1117_v46 = vpop.f32.mrf.mxu3 }
 0x188   : > { %v3555_v59 = vmul.f32 %v1117_v46, %v914_v61  ;;  %v2250_v15 = vor.u32 %v2249_v14, %v2248_v6 }
 0x18a   : > { %v2254_v12 = vcvt.f32.s32 %v3555_v59  ;;  %v2252_v26 = vand.u32 2147483647, %v3555_v59  ;;  %v3577_v32 = vsel %vm2245_vm1, %v2250_v15, %v1138_v57  ;;  %v2257_v40 = vand.u32 2147483648, %v3555_v59 }
 0x18b   : > { %v3587_v41 = vsub.f32 %v1138_v57, %v3577_v32 }
 0x18c   : > { %v2255_v18 = vcvt.s32.f32 %v2254_v12  ;;  %vm3592_vm2 = vcmp.lt.f32.partialorder %v2252_v26, 8388608.0 }
 0x18e   : > { %v1175_v52 = vpop.f32.mrf.mxu1  ;;  %v2256_v35 = vand.u32 2147483647, %v2255_v18 }
 0x18f   : > { %v1120_v58 = vpop.f32.mrf.mxu3  ;;  %v3574_v11 = vmul.f32 %v1175_v52, %v3569_v17 }
 0x190   : > { %v3557_v1 = vmul.f32 %v1120_v58, %v915_v62  ;;  %v2258_v54 = vor.u32 %v2257_v40, %v2256_v35 }
 0x191   : > { %v2310_v42 = vcvt.f32.s32 %v3574_v11  ;;  %v2313_v62 = vand.u32 2147483648, %v3574_v11  ;;  %v2308_v26 = vand.u32 2147483647, %v3574_v11 }
 0x192   : > { %v2262_v13 = vcvt.f32.s32 %v3557_v1  ;;  %v2265_v30 = vand.u32 2147483648, %v3557_v1  ;;  %v2260_v49 = vand.u32 2147483647, %v3557_v1 }
 0x193   : > { %v2311_v61 = vcvt.s32.f32 %v2310_v42  ;;  %vm2309_vm9 = vcmp.lt.f32.partialorder %v2308_v26, 8388608.0 }
 0x194   : > { %v2263_v20 = vcvt.s32.f32 %v2262_v13  ;;  %vm2261_vm5 = vcmp.lt.f32.partialorder %v2260_v49, 8388608.0 }
 0x196   : > { %v1178_v63 = vpop.f32.mrf.mxu1  ;;  %v2264_v37 = vand.u32 2147483647, %v2263_v20  ;;  %v2312_v20 = vand.u32 2147483647, %v2311_v61 }
 0x197   : > { %v1123_v3 = vpop.f32.mrf.mxu3  ;;  %v3560_v4 = vmul.f32 %v1178_v63, %v3553_v0 }
 0x198   : > { %v3562_v5 = vmul.f32 %v1123_v3, %v916_v2  ;;  %v2266_v56 = vor.u32 %v2265_v30, %v2264_v37  ;;  %v2314_v42 = vor.u32 %v2313_v62, %v2312_v20 }
 0x199   : > { %v2318_v7 = vcvt.f32.s32 %v3560_v4  ;;  %v2321_v33 = vand.u32 2147483648, %v3560_v4  ;;  %v2316_v39 = vand.u32 2147483647, %v3560_v4 }
 0x19a   : > { %v2270_v28 = vcvt.f32.s32 %v3562_v5  ;;  %v2268_v52 = vand.u32 2147483647, %v3562_v5  ;;  %v2273_v58 = vand.u32 2147483648, %v3562_v5  ;;  %v3607_v13 = vsel %vm2261_vm5, %v2266_v56, %v3557_v1 }
 0x19b   : > { %v2319_v21 = vcvt.s32.f32 %v2318_v7  ;;  %vm2317_vm3 = vcmp.lt.f32.partialorder %v2316_v39, 8388608.0  ;;  %v3628_v37 = vsub.f32 %v3557_v1, %v3607_v13 }
 0x19c   : > { %v2271_v34 = vcvt.s32.f32 %v2270_v28  ;;  %vm2269_vm6 = vcmp.lt.f32.partialorder %v2268_v52, 8388608.0  ;;  %v2315_v52 = vsel %vm2309_vm9, %v2314_v42, %v3574_v11 }
 0x19d   : > { %v2320_v22 = vand.u32 2147483647, %v2319_v21  ;;  %v919_v21 = vld [vmem:[#allocation17 + $0x30] sm:$0xff] }
 0x19e   : > { %v1181_v27 = vpop.f32.mrf.mxu1  ;;  %v2272_v48 = vand.u32 2147483647, %v2271_v34 }
 0x19f   : > { %v1126_v9 = vpop.f32.mrf.mxu3  ;;  %v1189_v19 = vmul.f32 %v1181_v27, %v3567_v8  ;;  %v2322_v50 = vor.u32 %v2321_v33, %v2320_v22 }
 0x1a0   : > { %v3580_v23 = vmul.f32 %v1126_v9, %v917_v10  ;;  %v2274_v2 = vor.u32 %v2273_v58, %v2272_v48 }
 0x1a1   : > { %v2326_v25 = vcvt.f32.s32 %v1189_v19  ;;  %v2329_v24 = vand.u32 2147483648, %v1189_v19  ;;  %v2324_v29 = vand.u32 2147483647, %v1189_v19  ;;  %v3604_v3 = vsel %vm2317_vm3, %v2322_v50, %v3560_v4 }
 0x1a2   : > { %v2278_v46 = vcvt.f32.s32 %v3580_v23  ;;  %v2276_v16 = vand.u32 2147483647, %v3580_v23  ;;  %v1289_v9 = vsub.f32 %v3560_v4, %v3604_v3 }
 0x1a3   : > { %v2327_v36 = vcvt.s32.f32 %v2326_v25  ;;  %vm2325_vm4 = vcmp.lt.f32.partialorder %v2324_v29, 8388608.0  ;;  %v3617_v25 = vsel %vm2269_vm6, %v2274_v2, %v3562_v5 }
 0x1a4   : > { %v2279_v12 = vcvt.s32.f32 %v2278_v46  ;;  %v3632_v39 = vsub.f32 %v3562_v5, %v3617_v25  ;;  %v1293_v40 = vmul.f32 %v1289_v9, %v1289_v9  ;;  %vm3635_vm8 = vcmp.lt.f32.partialorder %v2276_v16, 8388608.0  ;;  %v3653_v16 = vld [vmem:[#allocation22 + $0x18] sm:$0xff] }
 0x1a5   : > { %v1220_v44 = vpop.f32.mrf.mxu2  ;;  %v2328_v47 = vand.u32 2147483647, %v2327_v36 }
 0x1a6   : > { %v1184_v31 = vpop.f32.mrf.mxu1  ;;  %v3614_v10 = vmul.f32 %v1220_v44, %v3569_v17  ;;  %v2280_v34 = vand.u32 2147483647, %v2279_v12  ;;  %v2281_v17 = vand.u32 2147483648, %v3580_v23  ;;  %v1297_v56 = vmul.f32 %v1293_v40, %v1289_v9  ;;  %v3664_v9 = vld [vmem:[#allocation22 + $0x8] sm:$0xff] }
 0x1a7   : > { %v1129_v55 = vpop.f32.mrf.mxu3  ;;  %v1190_v45 = vmul.f32 %v1184_v31, %v3582_v38  ;;  %v2330_v60 = vor.u32 %v2329_v24, %v2328_v47 }
 0x1a8   : > { %v3598_v57 = vmul.f32 %v1129_v55, %v918_v43  ;;  %v2342_v43 = vcvt.f32.s32 %v3614_v10  ;;  %v2345_v47 = vand.u32 2147483648, %v3614_v10  ;;  %v2282_v30 = vor.u32 %v2281_v17, %v2280_v34  ;;  %v3675_v17 = vld [vmem:[#allocation22] sm:$0xff] }
 0x1a9   : > { %v2334_v53 = vcvt.f32.s32 %v1190_v45  ;;  %v2332_v63 = vand.u32 2147483647, %v1190_v45  ;;  %v2337_v7 = vand.u32 2147483648, %v1190_v45  ;;  %v2331_v15 = vsel %vm2325_vm4, %v2330_v60, %v1189_v19 }
 0x1aa   : > { %v2286_v14 = vcvt.f32.s32 %v3598_v57  ;;  %v1290_v18 = vsub.f32 %v1189_v19, %v2331_v15  ;;  %v3623_v19 = vsel %vm3592_vm2, %v2258_v54, %v3555_v59  ;;  %v2284_v49 = vand.u32 2147483647, %v3598_v57  ;;  %v920_v54 = vld [vmem:[#allocation17 + $0x38] sm:$0xff] }
 0x1ab   : > { %v2335_v6 = vcvt.s32.f32 %v2334_v53  ;;  %vm2333_vm7 = vcmp.lt.f32.partialorder %v2332_v63, 8388608.0  ;;  %v2289_v50 = vand.u32 2147483648, %v3598_v57  ;;  %v3649_v62 = vcvt.s32.f32 %v2342_v43 }
 0x1ac   : > { %v1294_v35 = vmul.f32 %v1290_v18, %v1290_v18  ;;  %v2287_v36 = vcvt.s32.f32 %v2286_v14  ;;  %vm2285_vm11 = vcmp.lt.f32.partialorder %v2284_v49, 8388608.0 }
 0x1ad   : > { %v1223_v27 = vpop.f32.mrf.mxu2  ;;  %v2336_v28 = vand.u32 2147483647, %v2335_v6 }
 0x1ae   : > { %v1298_v31 = vmul.f32 %v1294_v35, %v1290_v18  ;;  %v2288_v5 = vand.u32 2147483647, %v2287_v36  ;;  %v3643_v51 = vmul.f32 %v1223_v27, %v3553_v0  ;;  %v1288_v0 = vsub.f32 %v3574_v11, %v2315_v52 }
 0x1af   : > { %v1132_v33 = vpop.f32.mrf.mxu3  ;;  %v2338_v22 = vor.u32 %v2337_v7, %v2336_v28  ;;  %v1301_v28 = vadd.f32 %v3604_v3, %v1297_v56  ;;  %v3686_v56 = vld [vmem:[#allocation14] sm:$0xff] }
 0x1b0   : > { %v1144_v4 = vmul.f32 %v1132_v33, %v919_v21  ;;  %v1302_v2 = vadd.f32 %v2331_v15, %v1298_v31  ;;  %v2290_v14 = vor.u32 %v2289_v50, %v2288_v5  ;;  %v3655_v21 = vld [vmem:[#allocation22 + $0x10] sm:$0xff]  ;;  %v1292_v15 = vmul.f32 %v1288_v0, %v1288_v0 }
 0x1b1   : > { %v2339_v24 = vsel %vm2333_vm7, %v2338_v22, %v1190_v45  ;;  %v2350_v11 = vcvt.f32.s32 %v3643_v51  ;;  %v1305_v43 = vmul.f32 %v1301_v28, %v3664_v9 }
 0x1b2   : > { %v2294_v44 = vcvt.f32.s32 %v1144_v4  ;;  %v1291_v1 = vsub.f32 %v1190_v45, %v2339_v24  ;;  %v2292_v45 = vand.u32 2147483647, %v1144_v4  ;;  %v2297_v61 = vand.u32 2147483648, %v1144_v4 }
 0x1b3   : > { %v1306_v33 = vmul.f32 %v1302_v2, %v3655_v21  ;;  %v1296_v34 = vmul.f32 %v1292_v15, %v1288_v0  ;;  %v3671_v36 = vsel %vm2285_vm11, %v2290_v14, %v3598_v57  ;;  %v2351_v29 = vcvt.s32.f32 %v2350_v11 }
 0x1b4   : > { %v2295_v48 = vcvt.s32.f32 %v2294_v44  ;;  %v1295_v46 = vmul.f32 %v1291_v1, %v1291_v1  ;;  %vm2293_vm10 = vcmp.lt.f32.partialorder %v2292_v45, 8388608.0  ;;  %v2348_v2 = vand.u32 2147483647, %v3643_v51 }
 0x1b5   : > { %v1226_v55 = vpop.f32.mrf.mxu2  ;;  %v1300_v44 = vadd.f32 %v2315_v52, %v1296_v34  ;;  %v2344_v14 = vand.u32 2147483647, %v3649_v62  ;;  %v1254_v15 = vmul.f32 %v3628_v37, %v3628_v37  ;;  %v1245_v11 = vsub.f32 %v3555_v59, %v3623_v19  ;;  %v928_v62 = vld [vmem:[#allocation19 + $0x38] sm:$0xff] }
 0x1b6   : > { %v3647_v58 = vmul.f32 %v1226_v55, %v3567_v8  ;;  %v2296_v60 = vand.u32 2147483647, %v2295_v48  ;;  %v1299_v63 = vmul.f32 %v1295_v46, %v1291_v1  ;;  %v3660_v8 = vsel %vm3635_vm8, %v2282_v30, %v3580_v23 }
 0x1b7   : > { %v1135_v53 = vpop.f32.mrf.mxu3  ;;  %v1248_v3 = vsub.f32 %v3580_v23, %v3660_v8  ;;  %v2353_v48 = vand.u32 2147483648, %v3643_v51  ;;  %v1249_v23 = vsub.f32 %v3598_v57, %v3671_v36  ;;  %v1304_v5 = vmul.f32 %v1300_v44, %v3675_v17 }
 0x1b8   : > { %v1145_v6 = vmul.f32 %v1135_v53, %v920_v54  ;;  %v2358_v7 = vcvt.f32.s32 %v3647_v58  ;;  %v2298_v12 = vor.u32 %v2297_v61, %v2296_v60  ;;  %v1303_v27 = vadd.f32 %v2339_v24, %v1299_v63 }
 0x1b9   : > { %v2361_v49 = vand.u32 2147483648, %v3647_v58  ;;  %v2356_v54 = vand.u32 2147483647, %v3647_v58  ;;  %v2352_v61 = vand.u32 2147483647, %v2351_v29  ;;  %v1257_v53 = vmul.f32 %v1249_v23, %v1249_v23  ;;  %v3709_v29 = vld [vmem:[#allocation14 + $0x8] sm:$0xff] }
 0x1ba   : > { %v2302_v18 = vcvt.f32.s32 %v1145_v6  ;;  %v3666_v20 = vsel %vm2293_vm10, %v2298_v12, %v1144_v4  ;;  %v1307_v26 = vmul.f32 %v1303_v27, %v3653_v16  ;;  %v2359_v22 = vcvt.s32.f32 %v2358_v7 }
 0x1bb   : > { %v2300_v40 = vand.u32 2147483647, %v1145_v6  ;;  %v1250_v42 = vsub.f32 %v1144_v4, %v3666_v20  ;;  %v2305_v31 = vand.u32 2147483648, %v1145_v6  ;;  %v1256_v63 = vmul.f32 %v1248_v3, %v1248_v3 }
 0x1bc   : > { %v2303_v35 = vcvt.s32.f32 %v2302_v18  ;;  %1499 = vmatpush.msrb.mxu2 %v1307_v26  ;;  %v2360_v55 = vand.u32 2147483647, %v2359_v22  ;;  %vm3689_vm14 = vcmp.lt.f32.partialorder %v2356_v54, 8388608.0  ;;  %v2354_v26 = vor.u32 %v2353_v48, %v2352_v61 }
 0x1bd   : > { %v1229_v24 = vpop.f32.mrf.mxu2  ;;  %vm2301_vm12 = vcmp.lt.f32.partialorder %v2300_v40, 8388608.0  ;;  %v1265_v34 = vmul.f32 %v1257_v53, %v1249_v23  ;;  %v1255_v22 = vmul.f32 %v3632_v39, %v3632_v39  ;;  %vm2349_vm1 = vcmp.lt.f32.partialorder %v2348_v2, 8388608.0 }
 0x1be   : > { %v1235_v30 = vmul.f32 %v1229_v24, %v3582_v38  ;;  %v2304_v1 = vand.u32 2147483647, %v2303_v35  ;;  %1500 = vmatpush.msrb.mxu2 %v1306_v33  ;;  %v1258_v38 = vmul.f32 %v1250_v42, %v1250_v42  ;;  %v2362_v12 = vor.u32 %v2361_v49, %v2360_v55  ;;  %v925_v55 = vld [vmem:[#allocation19 + $0x20] sm:$0xff] }
 0x1bf   : > { %v1264_v35 = vmul.f32 %v1256_v63, %v1248_v3  ;;  %v2355_v48 = vsel %vm2349_vm1, %v2354_v26, %v3643_v51  ;;  %v1273_v49 = vadd.f32 %v3671_v36, %v1265_v34  ;;  %v1263_v23 = vmul.f32 %v1255_v22, %v3632_v39  ;;  %v903_v63 = vld [vmem:[#allocation14 + $0x10] sm:$0xff] }
 0x1c0   : > { %v2366_v4 = vcvt.f32.s32 %v1235_v30  ;;  %v2306_v50 = vor.u32 %v2305_v31, %v2304_v1  ;;  %v2364_v46 = vand.u32 2147483647, %v1235_v30  ;;  %1501 = vmatpush.msrb.mxu2 %v1305_v43  ;;  %v2369_v45 = vand.u32 2147483648, %v1235_v30  ;;  %v927_v1 = vld [vmem:[#allocation19 + $0x30] sm:$0xff] }
 0x1c1   : > { %v1266_v28 = vmul.f32 %v1258_v38, %v1250_v42  ;;  %v2363_v40 = vsel %vm3689_vm14, %v2362_v12, %v3647_v58  ;;  %v2346_v42 = vor.u32 %v2345_v47, %v2344_v14  ;;  %v1253_v31 = vmul.f32 %v1245_v11, %v1245_v11  ;;  %v922_v12 = vld [vmem:[#allocation19 + $0x8] sm:$0xff] }
 0x1c2   : > { %v2367_v52 = vcvt.s32.f32 %v2366_v4  ;;  %v2307_v60 = vsel %vm2301_vm12, %v2306_v50, %v1145_v6  ;;  %1502 = vmatpush.msrb.mxu2 %v1304_v5  ;;  %vm2365_vm15 = vcmp.lt.f32.partialorder %v2364_v46, 8388608.0  ;;  %v1314_v5 = vsub.f32 %v3647_v58, %v2363_v40  ;;  %v926_v4 = vld [vmem:[#allocation19 + $0x28] sm:$0xff] }
 0x1c3   : > { %v1251_v57 = vsub.f32 %v1145_v6, %v2307_v60  ;;  %2182 = vmatmul.msk.f32.vlgmr.msrb.gmra.mxu2 %vm1462_vm13, %v3686_v56  ;;  %v2340_v6 = vand.u32 2147483647, %v3614_v10  ;;  %v1274_v59 = vadd.f32 %v3666_v20, %v1266_v28  ;;  %v1262_v47 = vmul.f32 %v1254_v15, %v3628_v37 }
 0x1c4   : > { %v2368_v0 = vand.u32 2147483647, %v2367_v52  ;;  %v1252_v20 = vmul.f32 %v3587_v41, %v3587_v41  ;;  %v1272_v54 = vadd.f32 %v3660_v8, %v1264_v35  ;;  %v1313_v39 = vsub.f32 %v3643_v51, %v2355_v48  ;;  %v923_v51 = vld [vmem:[#allocation19 + $0x10] sm:$0xff]  ;;  %v874_v35 = vld [vmem:[#allocation8 + $0x8] sm:$0xff] }
 0x1c5   : > { %v1259_v27 = vmul.f32 %v1251_v57, %v1251_v57  ;;  %vm2341_vm2 = vcmp.lt.f32.partialorder %v2340_v6, 8388608.0  ;;  %v1282_v50 = vmul.f32 %v1274_v59, %v927_v1  ;;  %v1261_v58 = vmul.f32 %v1253_v31, %v1245_v11  ;;  %v879_v59 = vld [vmem:[#allocation8 + $0x30] sm:$0xff]  ;;  %v888_v1 = vld [vmem:[#allocation10 + $0x38] sm:$0xff] }
 0x1c6   : > { %v2370_v18 = vor.u32 %v2369_v45, %v2368_v0  ;;  %v1281_v46 = vmul.f32 %v1273_v49, %v926_v4  ;;  %v1271_v37 = vadd.f32 %v3617_v25, %v1263_v23  ;;  %v1318_v38 = vmul.f32 %v1314_v5, %v1314_v5  ;;  %v924_v45 = vld [vmem:[#allocation19 + $0x18] sm:$0xff]  ;;  %1429 = vmatpush.msrb.mxu1 %v888_v1  ;;  %v887_v31 = vld [vmem:[#allocation10 + $0x30] sm:$0xff]  ;;  %v910_v4 = vld [vmem:[#allocation16 + $0x8] sm:$0xff] }
 0x1c7   : > { %v1267_v33 = vmul.f32 %v1259_v27, %v1251_v57  ;;  %v1280_v61 = vmul.f32 %v1272_v54, %v925_v55  ;;  %v1270_v57 = vadd.f32 %v3607_v13, %v1262_v47  ;;  %v1317_v53 = vmul.f32 %v1313_v39, %v1313_v39  ;;  %v921_v13 = vld [vmem:[#allocation19] sm:$0xff]  ;;  %v912_v49 = vld [vmem:[#allocation16 + $0x18] sm:$0xff] }
 0x1c8   : > { %v2371_v24 = vsel %vm2365_vm15, %v2370_v18, %v1235_v30  ;;  %v1279_v2 = vmul.f32 %v1271_v37, %v924_v45  ;;  %v1269_v0 = vadd.f32 %v3623_v19, %v1261_v58  ;;  %v1322_v7 = vmul.f32 %v1318_v38, %v1314_v5  ;;  %v873_v18 = vld [vmem:[#allocation8] sm:$0xff]  ;;  %1430 = vmatpush.msrb.mxu1 %v887_v31  ;;  %v884_v23 = vld [vmem:[#allocation10 + $0x18] sm:$0xff]  ;;  %v911_v5 = vld [vmem:[#allocation16 + $0x10] sm:$0xff] }
 0x1c9   : > { %v1275_v43 = vadd.f32 %v2307_v60, %v1267_v33  ;;  %v1315_v44 = vsub.f32 %v1235_v30, %v2371_v24  ;;  %v2347_v30 = vsel %vm2341_vm2, %v2346_v42, %v3614_v10  ;;  %v1260_v60 = vmul.f32 %v1252_v20, %v3587_v41  ;;  %v904_v33 = vld [vmem:[#allocation14 + $0x18] sm:$0xff]  ;;  %v907_v42 = vld [vmem:[#allocation14 + $0x30] sm:$0xff]  ;;  %1564 = vmatpush.msra.mxu3 %v912_v49  ;;  %v909_v47 = vld [vmem:[#allocation16] sm:$0xff] }
 0x1ca   : > { %v1312_v52 = vsub.f32 %v3614_v10, %v2347_v30  ;;  %v1278_v10 = vmul.f32 %v1270_v57, %v923_v51  ;;  %v1321_v27 = vmul.f32 %v1317_v53, %v1313_v39  ;;  %v1277_v28 = vmul.f32 %v1269_v0, %v922_v12  ;;  %v881_v20 = vld [vmem:[#allocation10] sm:$0xff] }
 0x1cb   : > { %v1283_v3 = vmul.f32 %v1275_v43, %v928_v62  ;;  %2183 = vmatmul.msk.f32.gmra.mxu2 %vm1462_vm13, %v3709_v29  ;;  %v1319_v36 = vmul.f32 %v1315_v44, %v1315_v44  ;;  %v1268_v41 = vadd.f32 %v3577_v32, %v1260_v60  ;;  %v1326_v6 = vadd.f32 %v2363_v40, %v1322_v7  ;;  %v876_v40 = vld [vmem:[#allocation8 + $0x18] sm:$0xff]  ;;  %v878_v43 = vld [vmem:[#allocation8 + $0x28] sm:$0xff] }
 0x1cc   : > { %v1316_v25 = vmul.f32 %v1312_v52, %v1312_v52  ;;  %v1325_v26 = vadd.f32 %v2355_v48, %v1321_v27  ;;  %v886_v48 = vld [vmem:[#allocation10 + $0x28] sm:$0xff]  ;;  %1565 = vmatpush.msra.mxu3 %v911_v5 }
 0x1cd   : > { %1364 = vmatpush.msrb.mxu0 %v1283_v3  ;;  %v1323_v8 = vmul.f32 %v1319_v36, %v1315_v44  ;;  %v1276_v11 = vmul.f32 %v1268_v41, %v921_v13  ;;  %v1330_v34 = vmul.f32 %v1326_v6, %v3655_v21  ;;  %v906_v21 = vld [vmem:[#allocation14 + $0x28] sm:$0xff]  ;;  %v880_v44 = vld [vmem:[#allocation8 + $0x38] sm:$0xff]  ;;  %v885_v3 = vld [vmem:[#allocation10 + $0x20] sm:$0xff]  ;;  %1431 = vmatpush.msrb.mxu1 %v886_v48 }
 0x1ce   : > { %v1320_v15 = vmul.f32 %v1316_v25, %v1312_v52  ;;  %v1329_v32 = vmul.f32 %v1325_v26, %v3664_v9  ;;  %v877_v9 = vld [vmem:[#allocation8 + $0x20] sm:$0xff]  ;;  %1566 = vmatpush.msra.mxu3 %v910_v4 }
 0x1cf   : > { %1365 = vmatpush.msrb.mxu0 %v1282_v50  ;;  %v1327_v14 = vadd.f32 %v2371_v24, %v1323_v8  ;;  %v905_v24 = vld [vmem:[#allocation14 + $0x20] sm:$0xff]  ;;  %1432 = vmatpush.msrb.mxu1 %v885_v3 }
 0x1d0   : > { %v1324_v22 = vadd.f32 %v2347_v30, %v1320_v15  ;;  %1567 = vmatpush.msra.mxu3 %v909_v47 }
 0x1d1   : > { %1366 = vmatpush.msrb.mxu0 %v1281_v46  ;;  %v1331_v19 = vmul.f32 %v1327_v14, %v3653_v16  ;;  %v875_v16 = vld [vmem:[#allocation8 + $0x10] sm:$0xff]  ;;  %1433 = vmatpush.msrb.mxu1 %v884_v23 }
 0x1d2   : > { %v1328_v62 = vmul.f32 %v1324_v22, %v3675_v17  ;;  %v908_v17 = vld [vmem:[#allocation14 + $0x38] sm:$0xff] }
 0x1d3   : > { %1367 = vmatpush.msrb.mxu0 %v1280_v61  ;;  %2184 = vmatmul.msk.f32.gmra.mxu2 %vm1462_vm13, %v903_v63 }
 0x1d5   : > { %1368 = vmatpush.msrb.mxu0 %v1279_v2 }
 0x1d7   : > { %1369 = vmatpush.msrb.mxu0 %v1278_v10 }
 0x1d9   : > { %1370 = vmatpush.msrb.mxu0 %v1277_v28 }
 0x1db   : > { %1371 = vmatpush.msrb.mxu0 %v1276_v11  ;;  %2185 = vmatmul.msk.f32.gmra.mxu2 %vm1462_vm13, %v904_v33 }
 0x1dc   : > { %2166 = vmatmul.msk.f32.vlgmr.msrb.gmra.mxu0 %vm937_vm0, %v873_v18 }
 0x1dd   : > { %1605 = vmatpush.msra.mxu0 %v1331_v19 }
 0x1df   : > { %1606 = vmatpush.msra.mxu0 %v1330_v34 }
 0x1e1   : > { %1607 = vmatpush.msra.mxu0 %v1329_v32 }
 0x1e3   : > { %1608 = vmatpush.msra.mxu0 %v1328_v62  ;;  %2186 = vmatmul.msk.f32.gmra.mxu2 %vm1462_vm13, %v905_v24 }
 0x1e4   : > { %2167 = vmatmul.msk.f32.gmra.mxu0 %vm937_vm0, %v874_v35 }
 0x1eb   : > { %2187 = vmatmul.msk.f32.gmra.mxu2 %vm1462_vm13, %v906_v21 }
 0x1ec   : > { %2168 = vmatmul.msk.f32.gmra.mxu0 %vm937_vm0, %v875_v16 }
 0x1f3   : > { %2188 = vmatmul.msk.f32.gmra.mxu2 %vm1462_vm13, %v907_v42 }
 0x1f4   : > { %2169 = vmatmul.msk.f32.gmra.mxu0 %vm937_vm0, %v876_v40 }
 0x1fb   : > { %2189 = vmatmul.msk.f32.gmra.mxu2 %vm1462_vm13, %v908_v17 }
 0x1fc   : > { %2170 = vmatmul.msk.f32.gmra.mxu0 %vm937_vm0, %v877_v9 }
 0x204   : > { %2171 = vmatmul.msk.f32.gmra.mxu0 %vm937_vm0, %v878_v43 }
 0x20c   : > { %2172 = vmatmul.msk.f32.gmra.mxu0 %vm937_vm0, %v879_v59 }
 0x214   : > { %2173 = vmatmul.msk.f32.gmra.mxu0 %vm937_vm0, %v880_v44 }
 0x21c   : > { %2198 = vmatmul.msk.f32.vlgmr.msra.gmra.mxu0 %vm1462_vm13, %v3686_v56  ;;  %v883_v56 = vld [vmem:[#allocation10 + $0x10] sm:$0xff] }
 0x21d   : > { %1434 = vmatpush.msrb.mxu1 %v883_v56 }
 0x224   : > { %2199 = vmatmul.msk.f32.gmra.mxu0 %vm1462_vm13, %v3709_v29  ;;  %v882_v29 = vld [vmem:[#allocation10 + $0x8] sm:$0xff] }
 0x225   : > { %1435 = vmatpush.msrb.mxu1 %v882_v29 }
 0x227   : > { %1436 = vmatpush.msrb.mxu1 %v881_v20 }
 0x229   : > { %1670 = vmatpush.msra.mxu1 %v912_v49 }
 0x22b   : > { %1671 = vmatpush.msra.mxu1 %v911_v5 }
 0x22c   : > { %2200 = vmatmul.msk.f32.gmra.mxu0 %vm1462_vm13, %v903_v63 }
 0x22d   : > { %1672 = vmatpush.msra.mxu1 %v910_v4 }
 0x22f   : > { %1673 = vmatpush.msra.mxu1 %v909_v47 }
 0x234   : > { %2201 = vmatmul.msk.f32.gmra.mxu0 %vm1462_vm13, %v904_v33 }
 0x23c   : > { %2202 = vmatmul.msk.f32.gmra.mxu0 %vm1462_vm13, %v905_v24 }
 0x244   : > { %2203 = vmatmul.msk.f32.gmra.mxu0 %vm1462_vm13, %v906_v21 }
 0x246   : > { %v1504_v30 = vpop.f32.mrf.mxu2 }
 0x247   : > { %2190 = vmatmul.msk.f32.vlgmr.msra.gmra.mxu3 %vm1462_vm13, %v1504_v30 }
 0x24c   : > { %2204 = vmatmul.msk.f32.gmra.mxu0 %vm1462_vm13, %v907_v42 }
 0x24e   : > { %v1507_v50 = vpop.f32.mrf.mxu2 }
 0x24f   : > { %2191 = vmatmul.msk.f32.gmra.mxu3 %vm1462_vm13, %v1507_v50 }
 0x254   : > { %2205 = vmatmul.msk.f32.gmra.mxu0 %vm1462_vm13, %v908_v17 }
 0x256   : > { %v1510_v54 = vpop.f32.mrf.mxu2 }
 0x257   : > { %2192 = vmatmul.msk.f32.gmra.mxu3 %vm1462_vm13, %v1510_v54 }
 0x259   : > { %v1373_v36 = vpop.f32.mrf.mxu0 }
 0x25a   : > { %2174 = vmatmul.msk.f32.vlgmr.msrb.gmra.mxu1 %vm937_vm0, %v1373_v36 }
 0x25e   : > { %v1513_v39 = vpop.f32.mrf.mxu2 }
 0x25f   : > { %2193 = vmatmul.msk.f32.gmra.mxu3 %vm1462_vm13, %v1513_v39 }
 0x261   : > { %v1376_v55 = vpop.f32.mrf.mxu0 }
 0x262   : > { %2175 = vmatmul.msk.f32.gmra.mxu1 %vm937_vm0, %v1376_v55 }
 0x266   : > { %v1516_v58 = vpop.f32.mrf.mxu2 }
 0x267   : > { %2194 = vmatmul.msk.f32.gmra.mxu3 %vm1462_vm13, %v1516_v58 }
 0x269   : > { %v1379_v46 = vpop.f32.mrf.mxu0 }
 0x26a   : > { %2176 = vmatmul.msk.f32.gmra.mxu1 %vm937_vm0, %v1379_v46 }
 0x26e   : > { %v1519_v37 = vpop.f32.mrf.mxu2 }
 0x26f   : > { %2195 = vmatmul.msk.f32.gmra.mxu3 %vm1462_vm13, %v1519_v37 }
 0x271   : > { %v1382_v38 = vpop.f32.mrf.mxu0 }
 0x272   : > { %2177 = vmatmul.msk.f32.gmra.mxu1 %vm937_vm0, %v1382_v38 }
 0x276   : > { %v1522_v52 = vpop.f32.mrf.mxu2 }
 0x277   : > { %2196 = vmatmul.msk.f32.gmra.mxu3 %vm1462_vm13, %v1522_v52 }
 0x279   : > { %v1385_v45 = vpop.f32.mrf.mxu0 }
 0x27a   : > { %2178 = vmatmul.msk.f32.gmra.mxu1 %vm937_vm0, %v1385_v45 }
 0x27e   : > { %v1525_v60 = vpop.f32.mrf.mxu2 }
 0x27f   : > { %2197 = vmatmul.msk.f32.gmra.mxu3 %vm1462_vm13, %v1525_v60 }
 0x281   : > { %v1388_v61 = vpop.f32.mrf.mxu0 }
 0x282   : > { %2179 = vmatmul.msk.f32.gmra.mxu1 %vm937_vm0, %v1388_v61 }
 0x289   : > { %v1391_v57 = vpop.f32.mrf.mxu0 }
 0x28a   : > { %2180 = vmatmul.msk.f32.gmra.mxu1 %vm937_vm0, %v1391_v57 }
 0x291   : > { %v1394_v8 = vpop.f32.mrf.mxu0 }
 0x292   : > { %2181 = vmatmul.msk.f32.gmra.mxu1 %vm937_vm0, %v1394_v8 }
 0x299   : > { %v1610_v53 = vpop.f32.mrf.mxu0 }
 0x29a   : > { %2206 = vmatmul.msk.f32.vlgmr.msra.gmra.mxu1 %vm1462_vm13, %v1610_v53 }
 0x2a1   : > { %v1613_v63 = vpop.f32.mrf.mxu0 }
 0x2a2   : > { %2207 = vmatmul.msk.f32.gmra.mxu1 %vm1462_vm13, %v1613_v63 }
 0x2a9   : > { %v1616_v51 = vpop.f32.mrf.mxu0 }
 0x2aa   : > { %2208 = vmatmul.msk.f32.gmra.mxu1 %vm1462_vm13, %v1616_v51 }
 0x2b1   : > { %v1619_v2 = vpop.f32.mrf.mxu0 }
 0x2b2   : > { %2209 = vmatmul.msk.f32.gmra.mxu1 %vm1462_vm13, %v1619_v2 }
 0x2b9   : > { %v1622_v0 = vpop.f32.mrf.mxu0 }
 0x2ba   : > { %2210 = vmatmul.msk.f32.gmra.mxu1 %vm1462_vm13, %v1622_v0 }
 0x2c1   : > { %v1625_v7 = vpop.f32.mrf.mxu0 }
 0x2c2   : > { %2211 = vmatmul.msk.f32.gmra.mxu1 %vm1462_vm13, %v1625_v7 }
 0x2c9   : > { %v1628_v25 = vpop.f32.mrf.mxu0 }
 0x2ca   : > { %2212 = vmatmul.msk.f32.gmra.mxu1 %vm1462_vm13, %v1628_v25  ;;  %v3780_v12 = vpop.f32.mrf.mxu3 }
 0x2cb   : > { %v1812_v14 = vmul.f32 1.772, %v3780_v12  ;;  %v1747_v7 = vmul.f32 0.344136, %v3780_v12 }
 0x2d1   : > { %v1631_v10 = vpop.f32.mrf.mxu0 }
 0x2d2   : > { %2213 = vmatmul.msk.f32.gmra.mxu1 %vm1462_vm13, %v1631_v10  ;;  %v3783_v41 = vpop.f32.mrf.mxu3 }
 0x2d3   : > { %v1813_v18 = vmul.f32 1.772, %v3783_v41 }
 0x2d7   : > { %v1438_v27 = vpop.f32.mrf.mxu1 }
 0x2d8   : > { %v3786_v13 = vadd.f32 128.0, %v1438_v27 }
 0x2da   : > { %v1820_v28 = vadd.f32 %v1812_v14, %v3786_v13  ;;  %v3789_v6 = vpop.f32.mrf.mxu3  ;;  %v1755_v27 = vsub.f32 %v3786_v13, %v1747_v7 }
 0x2db   : > { %v1814_v35 = vmul.f32 1.772, %v3789_v6 }
 0x2dc   : > { %v1828_v15 = vmax.f32 %v1820_v28, 0.0 }
 0x2de   : > { %v1836_v11 = vmin.f32 %v1828_v15, 255.0 }
 0x2df   : > { %v1441_v19 = vpop.f32.mrf.mxu1 }
 0x2e0   : > { %v3792_v26 = vadd.f32 128.0, %v1441_v19  ;;  %v1844_v33 = vmul.f32 0.003921569, %v1836_v11 }
 0x2e2   : > { %2222 = vst.msk [vmem:[%s3796_s2 + $0x80] sm:$0xff] %vm937_vm0, %v1844_v33  ;;  %v1821_v34 = vadd.f32 %v1813_v18, %v3792_v26  ;;  %v3801_v22 = vpop.f32.mrf.mxu3 }
 0x2e3   : > { %v1815_v43 = vmul.f32 1.772, %v3801_v22 }
 0x2e4   : > { %v1829_v32 = vmax.f32 %v1821_v34, 0.0 }
 0x2e6   : > { %v1837_v62 = vmin.f32 %v1829_v32, 255.0  ;;  %v1748_v32 = vmul.f32 0.344136, %v3783_v41  ;;  %v1749_v41 = vmul.f32 0.344136, %v3789_v6 }
 0x2e7   : > { %v1444_v24 = vpop.f32.mrf.mxu1 }
 0x2e8   : > { %v3804_v16 = vadd.f32 128.0, %v1444_v24  ;;  %v1845_v21 = vmul.f32 0.003921569, %v1837_v62 }
 0x2ea   : > { %2223 = vst.msk [vmem:[%s3796_s2 + $0x88] sm:$0xff] %vm937_vm0, %v1845_v21  ;;  %v1822_v40 = vadd.f32 %v1814_v35, %v3804_v16  ;;  %v3809_v9 = vpop.f32.mrf.mxu3 }
 0x2eb   : > { %v1816_v49 = vmul.f32 1.772, %v3809_v9 }
 0x2ec   : > { %v1830_v42 = vmax.f32 %v1822_v40, 0.0 }
 0x2ee   : > { %v1838_v17 = vmin.f32 %v1830_v42, 255.0  ;;  %v1756_v42 = vsub.f32 %v3792_v26, %v1748_v32 }
 0x2ef   : > { %v1447_v59 = vpop.f32.mrf.mxu1 }
 0x2f0   : > { %v3812_v44 = vadd.f32 128.0, %v1447_v59  ;;  %v1846_v1 = vmul.f32 0.003921569, %v1838_v17 }
 0x2f2   : > { %2224 = vst.msk [vmem:[%s3796_s2 + $0x90] sm:$0xff] %vm937_vm0, %v1846_v1  ;;  %v1823_v31 = vadd.f32 %v1815_v43, %v3812_v44  ;;  %v3818_v5 = vpop.f32.mrf.mxu3 }
 0x2f3   : > { %v1817_v30 = vmul.f32 1.772, %v3818_v5 }
 0x2f4   : > { %v1831_v48 = vmax.f32 %v1823_v31, 0.0 }
 0x2f6   : > { %v1839_v3 = vmin.f32 %v1831_v48, 255.0 }
 0x2f7   : > { %v1450_v23 = vpop.f32.mrf.mxu1 }
 0x2f8   : > { %v3820_v4 = vadd.f32 128.0, %v1450_v23  ;;  %v1847_v56 = vmul.f32 0.003921569, %v1839_v3 }
 0x2fa   : > { %2225 = vst.msk [vmem:[%s3796_s2 + $0x98] sm:$0xff] %vm937_vm0, %v1847_v56  ;;  %v1824_v29 = vadd.f32 %v1816_v49, %v3820_v4  ;;  %v3828_v39 = vpop.f32.mrf.mxu3  ;;  %v1757_v49 = vsub.f32 %v3804_v16, %v1749_v41 }
 0x2fb   : > { %v1818_v37 = vmul.f32 1.772, %v3828_v39 }
 0x2fc   : > { %v1832_v47 = vmax.f32 %v1824_v29, 0.0 }
 0x2fe   : > { %v1840_v20 = vmin.f32 %v1832_v47, 255.0 }
 0x2ff   : > { %v1453_v50 = vpop.f32.mrf.mxu1 }
 0x300   : > { %v3826_v54 = vadd.f32 128.0, %v1453_v50  ;;  %v1848_v36 = vmul.f32 0.003921569, %v1840_v20  ;;  %v1750_v50 = vmul.f32 0.344136, %v3801_v22 }
 0x301   : > { %v1751_v22 = vmul.f32 0.344136, %v3809_v9 }
 0x302   : > { %2226 = vst.msk [vmem:[%s3796_s2 + $0xa0] sm:$0xff] %vm937_vm0, %v1848_v36  ;;  %v1825_v55 = vadd.f32 %v1817_v30, %v3826_v54  ;;  %v3839_v61 = vpop.f32.mrf.mxu3 }
 0x303   : > { %v1819_v53 = vmul.f32 1.772, %v3839_v61  ;;  %v1759_v7 = vsub.f32 %v3820_v4, %v1751_v22 }
 0x304   : > { %v1833_v58 = vmax.f32 %v1825_v55, 0.0 }
 0x306   : > { %v1841_v46 = vmin.f32 %v1833_v58, 255.0 }
 0x307   : > { %v1456_v38 = vpop.f32.mrf.mxu1 }
 0x308   : > { %v3834_v52 = vadd.f32 128.0, %v1456_v38  ;;  %v1849_v45 = vmul.f32 0.003921569, %v1841_v46 }
 0x30a   : > { %2227 = vst.msk [vmem:[%s3796_s2 + $0xa8] sm:$0xff] %vm937_vm0, %v1849_v45  ;;  %v1826_v60 = vadd.f32 %v1818_v37, %v3834_v52  ;;  %v1758_v45 = vsub.f32 %v3812_v44, %v1750_v50 }
 0x30c   : > { %v1834_v57 = vmax.f32 %v1826_v60, 0.0 }
 0x30e   : > { %v1842_v8 = vmin.f32 %v1834_v57, 255.0 }
 0x30f   : > { %v1459_v63 = vpop.f32.mrf.mxu1 }
 0x310   : > { %v3842_v51 = vadd.f32 128.0, %v1459_v63  ;;  %v1850_v2 = vmul.f32 0.003921569, %v1842_v8 }
 0x312   : > { %2228 = vst.msk [vmem:[%s3796_s2 + $0xb0] sm:$0xff] %vm937_vm0, %v1850_v2  ;;  %v1827_v0 = vadd.f32 %v1819_v53, %v3842_v51 }
 0x314   : > { %v1835_v25 = vmax.f32 %v1827_v0, 0.0 }
 0x316   : > { %v1843_v10 = vmin.f32 %v1835_v25, 255.0 }
 0x317   : > { %v1675_v14 = vpop.f32.mrf.mxu1 }
 0x318   : > { %v1699_v28 = vmul.f32 1.402, %v1675_v14  ;;  %v1763_v15 = vmul.f32 0.714136, %v1675_v14  ;;  %v1851_v11 = vmul.f32 0.003921569, %v1843_v10 }
 0x31a   : > { %v1707_v18 = vadd.f32 %v1699_v28, %v3786_v13  ;;  %v1771_v19 = vsub.f32 %v1755_v27, %v1763_v15  ;;  %2229 = vst.msk [vmem:[%s3796_s2 + $0xb8] sm:$0xff] %vm937_vm0, %v1851_v11  ;;  %v1752_v11 = vmul.f32 0.344136, %v3818_v5  ;;  %v1753_v5 = vmul.f32 0.344136, %v3828_v39 }
 0x31c   : > { %v1715_v33 = vmax.f32 %v1707_v18, 0.0  ;;  %v1779_v34 = vmax.f32 %v1771_v19, 0.0 }
 0x31e   : > { %v1723_v12 = vmin.f32 %v1715_v33, 255.0  ;;  %v1787_v62 = vmin.f32 %v1779_v34, 255.0 }
 0x31f   : > { %v1678_v35 = vpop.f32.mrf.mxu1 }
 0x320   : > { %v1731_v24 = vmul.f32 0.003921569, %v1723_v12  ;;  %v1795_v21 = vmul.f32 0.003921569, %v1787_v62  ;;  %v1700_v40 = vmul.f32 1.402, %v1678_v35  ;;  %v1760_v62 = vsub.f32 %v3826_v54, %v1752_v11 }
 0x321   : > { %v1764_v17 = vmul.f32 0.714136, %v1678_v35 }
 0x322   : > { %1739 = vst.msk [vmem:[%s3796_s2] sm:$0xff] %vm937_vm0, %v1731_v24  ;;  %v1708_v13 = vadd.f32 %v1700_v40, %v3792_v26 }
 0x323   : > { %2214 = vst.msk [vmem:[%s3796_s2 + $0x40] sm:$0xff] %vm937_vm0, %v1795_v21  ;;  %v1772_v43 = vsub.f32 %v1756_v42, %v1764_v17 }
 0x324   : > { %v1716_v59 = vmax.f32 %v1708_v13, 0.0 }
 0x325   : > { %v1780_v1 = vmax.f32 %v1772_v43, 0.0  ;;  %v1761_v43 = vsub.f32 %v3834_v52, %v1753_v5 }
 0x326   : > { %v1724_v31 = vmin.f32 %v1716_v59, 255.0 }
 0x327   : > { %v1788_v48 = vmin.f32 %v1780_v1, 255.0  ;;  %v1681_v3 = vpop.f32.mrf.mxu1 }
 0x328   : > { %v1732_v23 = vmul.f32 0.003921569, %v1724_v31  ;;  %v1701_v56 = vmul.f32 1.402, %v1681_v3  ;;  %v1765_v29 = vmul.f32 0.714136, %v1681_v3 }
 0x329   : > { %v1796_v47 = vmul.f32 0.003921569, %v1788_v48 }
 0x32a   : > { %1740 = vst.msk [vmem:[%s3796_s2 + $0x8] sm:$0xff] %vm937_vm0, %v1732_v23  ;;  %v1709_v26 = vadd.f32 %v1701_v56, %v3804_v16  ;;  %v1773_v20 = vsub.f32 %v1757_v49, %v1765_v29  ;;  %v1754_v49 = vmul.f32 0.344136, %v3839_v61 }
 0x32b   : > { %2215 = vst.msk [vmem:[%s3796_s2 + $0x48] sm:$0xff] %vm937_vm0, %v1796_v47 }
 0x32c   : > { %v1717_v6 = vmax.f32 %v1709_v26, 0.0  ;;  %v1781_v30 = vmax.f32 %v1773_v20, 0.0 }
 0x32e   : > { %v1725_v36 = vmin.f32 %v1717_v6, 255.0  ;;  %v1789_v55 = vmin.f32 %v1781_v30, 255.0  ;;  %v1762_v6 = vsub.f32 %v3842_v51, %v1754_v49 }
 0x32f   : > { %v1684_v58 = vpop.f32.mrf.mxu1 }
 0x330   : > { %v1733_v46 = vmul.f32 0.003921569, %v1725_v36  ;;  %v1797_v37 = vmul.f32 0.003921569, %v1789_v55  ;;  %v1702_v38 = vmul.f32 1.402, %v1684_v58 }
 0x331   : > { %v1766_v60 = vmul.f32 0.714136, %v1684_v58 }
 0x332   : > { %1741 = vst.msk [vmem:[%s3796_s2 + $0x10] sm:$0xff] %vm937_vm0, %v1733_v46  ;;  %v1710_v16 = vadd.f32 %v1702_v38, %v3812_v44 }
 0x333   : > { %2216 = vst.msk [vmem:[%s3796_s2 + $0x50] sm:$0xff] %vm937_vm0, %v1797_v37  ;;  %v1774_v57 = vsub.f32 %v1758_v45, %v1766_v60 }
 0x334   : > { %v1718_v8 = vmax.f32 %v1710_v16, 0.0 }
 0x335   : > { %v1782_v53 = vmax.f32 %v1774_v57, 0.0 }
 0x336   : > { %v1726_v63 = vmin.f32 %v1718_v8, 255.0 }
 0x337   : > { %v1790_v2 = vmin.f32 %v1782_v53, 255.0  ;;  %v1687_v0 = vpop.f32.mrf.mxu1 }
 0x338   : > { %v1734_v25 = vmul.f32 0.003921569, %v1726_v63  ;;  %v1703_v10 = vmul.f32 1.402, %v1687_v0  ;;  %v1767_v14 = vmul.f32 0.714136, %v1687_v0 }
 0x339   : > { %v1798_v27 = vmul.f32 0.003921569, %v1790_v2 }
 0x33a   : > { %1742 = vst.msk [vmem:[%s3796_s2 + $0x18] sm:$0xff] %vm937_vm0, %v1734_v25  ;;  %v1711_v44 = vadd.f32 %v1703_v10, %v3820_v4  ;;  %v1775_v28 = vsub.f32 %v1759_v7, %v1767_v14 }
 0x33b   : > { %2217 = vst.msk [vmem:[%s3796_s2 + $0x58] sm:$0xff] %vm937_vm0, %v1798_v27 }
 0x33c   : > { %v1719_v9 = vmax.f32 %v1711_v44, 0.0  ;;  %v1783_v15 = vmax.f32 %v1775_v28, 0.0 }
 0x33e   : > { %v1727_v18 = vmin.f32 %v1719_v9, 255.0  ;;  %v1791_v19 = vmin.f32 %v1783_v15, 255.0 }
 0x33f   : > { %v1690_v33 = vpop.f32.mrf.mxu1 }
 0x340   : > { %v1735_v34 = vmul.f32 0.003921569, %v1727_v18  ;;  %v1799_v32 = vmul.f32 0.003921569, %v1791_v19  ;;  %v1704_v12 = vmul.f32 1.402, %v1690_v33 }
 0x341   : > { %v1768_v35 = vmul.f32 0.714136, %v1690_v33 }
 0x342   : > { %1743 = vst.msk [vmem:[%s3796_s2 + $0x20] sm:$0xff] %vm937_vm0, %v1735_v34  ;;  %v1712_v4 = vadd.f32 %v1704_v12, %v3826_v54 }
 0x343   : > { %2218 = vst.msk [vmem:[%s3796_s2 + $0x60] sm:$0xff] %vm937_vm0, %v1799_v32  ;;  %v1776_v24 = vsub.f32 %v1760_v62, %v1768_v35 }
 0x344   : > { %v1720_v21 = vmax.f32 %v1712_v4, 0.0 }
 0x345   : > { %v1784_v40 = vmax.f32 %v1776_v24, 0.0 }
 0x346   : > { %v1728_v42 = vmin.f32 %v1720_v21, 255.0 }
 0x347   : > { %v1792_v17 = vmin.f32 %v1784_v40, 255.0  ;;  %v1693_v13 = vpop.f32.mrf.mxu1 }
 0x348   : > { %v1736_v41 = vmul.f32 0.003921569, %v1728_v42  ;;  %v1705_v59 = vmul.f32 1.402, %v1693_v13  ;;  %v1769_v1 = vmul.f32 0.714136, %v1693_v13 }
 0x349   : > { %v1800_v31 = vmul.f32 0.003921569, %v1792_v17 }
 0x34a   : > { %1744 = vst.msk [vmem:[%s3796_s2 + $0x28] sm:$0xff] %vm937_vm0, %v1736_v41  ;;  %v1713_v54 = vadd.f32 %v1705_v59, %v3834_v52  ;;  %v1777_v48 = vsub.f32 %v1761_v43, %v1769_v1 }
 0x34b   : > { %2219 = vst.msk [vmem:[%s3796_s2 + $0x68] sm:$0xff] %vm937_vm0, %v1800_v31 }
 0x34c   : > { %v1721_v39 = vmax.f32 %v1713_v54, 0.0  ;;  %v1785_v3 = vmax.f32 %v1777_v48, 0.0 }
 0x34e   : > { %v1729_v23 = vmin.f32 %v1721_v39, 255.0  ;;  %v1793_v56 = vmin.f32 %v1785_v3, 255.0 }
 0x34f   : > { %v1696_v29 = vpop.f32.mrf.mxu1 }
 0x350   : > { %v1737_v47 = vmul.f32 0.003921569, %v1729_v23  ;;  %v1801_v26 = vmul.f32 0.003921569, %v1793_v56  ;;  %v1706_v20 = vmul.f32 1.402, %v1696_v29 }
 0x351   : > { %v1770_v30 = vmul.f32 0.714136, %v1696_v29 }
 0x352   : > { %1745 = vst.msk [vmem:[%s3796_s2 + $0x30] sm:$0xff] %vm937_vm0, %v1737_v47  ;;  %v1714_v52 = vadd.f32 %v1706_v20, %v3842_v51 }
 0x353   : > { %2220 = vst.msk [vmem:[%s3796_s2 + $0x70] sm:$0xff] %vm937_vm0, %v1801_v26  ;;  %v1778_v61 = vsub.f32 %v1762_v6, %v1770_v30 }
 0x354   : > { %v1722_v50 = vmax.f32 %v1714_v52, 0.0 }
 0x355   : > { %v1786_v36 = vmax.f32 %v1778_v61, 0.0 }
 0x356   : > { %v1730_v55 = vmin.f32 %v1722_v50, 255.0 }
 0x357   : > { %v1794_v58 = vmin.f32 %v1786_v36, 255.0 }
 0x358   : > { %v1738_v46 = vmul.f32 0.003921569, %v1730_v55 }
 0x359   : > { %v1802_v37 = vmul.f32 0.003921569, %v1794_v58 }
 0x35a   : > { %1746 = vst.msk [vmem:[%s3796_s2 + $0x38] sm:$0xff] %vm937_vm0, %v1738_v46 }
 0x35b   : > { %2221 = vst.msk [vmem:[%s3796_s2 + $0x78] sm:$0xff] %vm937_vm0, %v1802_v37 }
 0x35c   : > { %2977 = shalt.err (!%p2974_p13)
}
 0x35d   : > { %s3072_s8 = smov 128   ;;  %s3073_s2 = smov 8  }
 0x35e   : > { %2423 = dma.vmem_to_hbm [thread:$0]  (%p3316_p2), %s1877_s24, 3072, %s1879_s3, %s1862_s0, %s3072_s8, %s3072_s8, %s3073_s2  }
 0x35f PF: > { %s1893_s5 = sand.u32 1, %s3036_s25   ;;  %p2467_p0 = pnand %p2095_p6, %p3323_p5 }
 0x360   : > { %s1894_s6 = scalar_lea.sflag [#allocation4], %s1893_s5 }
 0x361   : > { %p2468_p4 = pneg %p2467_p0 }
 0x363   : > { %3031 = dma.done.wait (%p2468_p4), %s1894_s6, 3072  }
 0x364   : > { %3033 = vsyncadd (%p2468_p4), %s1894_s6, 4294964224  ;;  %s35_s30 = sadd.s32 1, %s3056_s30   ;;  %s4003_s25 = smov %s3040_s26 }
 0x365   : > { %p32_p7 = scmp.ge.s32.totalorder %s35_s30, 4   ;;  %s4004_s26 = smov %s3044_s27 }
 0x366   : > { %s4005_s27 = smov %s3321_s13  ;;  %s4006_s28 = smov %s3052_s29 }
 0x367   : > { %s4007_s29 = smov %s4009_s19  ;;  %34 = sbr.rel (!%p32_p7) target bundleno = 23 (0x17), region = 169 }
 0x36c   :  { %1900 = vsyncpa [#allocation3], 1 }
 0x36d   :  { %1902 = vsyncpa [#allocation3 + $0x1], 1 }
 0x36e   :  { %1903 = vsyncpa [#allocation6], 1 }
 0x36f   :  { %1904 = vsyncpa [#allocation9], 1 }
 0x370   :  { %1905 = vsyncpa [#allocation12], 1 }
 0x371   :  { %1906 = vsyncpa [#allocation15], 1 }
 0x372   :  { %1907 = vsyncpa [#allocation18], 1 }
 0x373   :  { %1908 = vsyncpa [#allocation21], 1 }
 0x374   :  { %1909 = vsyncpa [#allocation4], 1 }
 0x375   :  { %1911 = vsyncpa [#allocation4 + $0x1], 1 }

</bundles_post_ra>
